<compile_context>
chip_gen: v6e
topology: v6e:2x2x1
jax: 0.10.0
libtpu: 0.0.40
codegen_flags: <defaults>
</compile_context>

<pallas_src>
import jax
import jax.numpy as jnp
from jax.experimental import pallas as pl
from jax.experimental.pallas import tpu as pltpu


def _round_up(x, m):
    return ((x + m - 1) // m) * m


# --------------------------- host-side weight fusion ---------------------------
def _pack_pixel_hnn_weights(params):
    """Fold / pre-transpose all weights ONCE and pack them into a single
    lane-aligned f32 slab (rows, 128k).  Returns (slab, layout, dims)."""
    f32 = jnp.float32
    we1, be1 = params["we1"].astype(f32), params["be1"].astype(f32)   # (PIX, AE_H), (1, AE_H)
    we2, be2 = params["we2"].astype(f32), params["be2"].astype(f32)   # (AE_H, D), (1, D)
    wd1, bd1 = params["wd1"].astype(f32), params["bd1"].astype(f32)   # (D, AE_H), (1, AE_H)
    wd2, bd2 = params["wd2"].astype(f32), params["bd2"].astype(f32)   # (AE_H, PIX), (1, PIX)
    w1h, b1h = params["w1h"].astype(f32), params["b1h"].astype(f32)
    w2h, b2h = params["w2h"].astype(f32), params["b2h"].astype(f32)
    w3h = params["w3h"].astype(f32)
    w1d, b1d = params["w1d"].astype(f32), params["b1d"].astype(f32)
    w2d, b2d = params["w2d"].astype(f32), params["b2d"].astype(f32)
    w3d = params["w3d"].astype(f32)

    PIX, AE_H = we1.shape
    D = we2.shape[1]
    H = w1h.shape[1]
    assert D % 2 == 0, "PixelHNN latent dim must be even (canonical (q, p) coords)"

    # ---- fuse the two scalar MLPs (hnn | diss) into one double-width net ----
    zhh = jnp.zeros((H, H), f32)
    w1c = jnp.concatenate([w1h, w1d], axis=1)                    # (D, 2H)
    b1c = jnp.concatenate([b1h, b1d], axis=1)                    # (1, 2H)
    w2c = jnp.block([[w2h, zhh], [zhh, w2d]])                    # (2H, 2H) block-diag
    b2c = jnp.concatenate([b2h, b2d], axis=1)                    # (1, 2H)
    w2cT = jnp.block([[w2h.T, zhh], [zhh, w2d.T]])               # (2H, 2H) block-diag of W2^T
    w3c = jnp.concatenate([w3h, w3d], axis=1)                    # (1, 2H)

    # ---- fold encoder layer-2 into the fused layer-1 (h1 computed from he) ----
    w1z = we2 @ w1c                                              # (AE_H, 2H)
    b1z = be2 @ w1c + b1c                                        # (1, 2H)

    # ---- symplectic permutation + W1^T + decoder layer-1, all folded ----
    d = D // 2
    eye, zdd = jnp.eye(d, dtype=f32), jnp.zeros((d, d), f32)
    msol = jnp.block([[zdd, -eye], [eye, zdd]])                  # dF_h @ msol == cat([dHdp, -dHdq])
    wout = jnp.concatenate([w1h.T @ msol, w1d.T], axis=0)        # (2H, D): g1 @ wout = sol + con
    wgd = wout @ wd1                                             # (2H, AE_H)
    wzd = we2 @ wd1                                              # (AE_H, AE_H)  skip path (z @ wd1)
    bzd = be2 @ wd1 + bd1                                        # (1, AE_H)

    # ---- lane-dense output weights (store width padded to a multiple of 128) ----
    pix_pad = _round_up(PIX, 128)
    wd2p = jnp.pad(wd2, ((0, 0), (0, pix_pad - PIX)))            # (AE_H, pix_pad)
    bd2p = jnp.pad(bd2, ((0, 0), (0, pix_pad - PIX)))            # (1, pix_pad)

    mats = [
        ("we1", we1), ("be1", be1),
        ("w1z", w1z), ("b1z", b1z),
        ("w2c", w2c), ("b2c", b2c),
        ("w2cT", w2cT), ("w3c", w3c),
        ("wzd", wzd), ("bzd", bzd),
        ("wgd", wgd),
        ("wd2p", wd2p), ("bd2p", bd2p),
    ]
    slab_w = _round_up(max(a.shape[1] for _, a in mats), 128)
    layout, blocks, off = {}, [], 0
    for name, a in mats:
        r, c = a.shape
        rp = _round_up(max(r, 1), 8)          # 8-row aligned blocks, lane 0 aligned
        layout[name] = (off, r, c)
        blocks.append(jnp.pad(a, ((0, rp - r), (0, slab_w - c))))
        off += rp
    slab = jnp.concatenate(blocks, axis=0)    # (rows, slab_w) single weight DMA
    dims = {"PIX": PIX, "AE_H": AE_H, "D": D, "H": H, "pix_pad": pix_pad}
    return slab, layout, dims


# --------------------------------- the kernel ---------------------------------
def _make_kernel(layout):
    def kernel(x_ref, w_ref, o_ref):
        f32 = jnp.float32

        def W(name):
            off, r, c = layout[name]         # static python ints -> pure sub-view
            return w_ref[off:off + r, 0:c]

        x = x_ref[...]
        # ---- encoder layer 1 ----
        he = jnp.tanh(jnp.dot(x, W("we1"), preferred_element_type=f32) + W("be1"))   # (B, AE_H)
        # ---- skip path: (z @ wd1) computed directly from he; off critical chain ----
        skip = jnp.dot(he, W("wzd"), preferred_element_type=f32)                     # (B, AE_H)
        # ---- fused (hnn | diss) forward, encoder layer-2 pre-folded into w1z/b1z ----
        h1 = jnp.tanh(jnp.dot(he, W("w1z"), preferred_element_type=f32) + W("b1z"))  # (B, 2H)
        h2 = jnp.tanh(jnp.dot(h1, W("w2c"), preferred_element_type=f32) + W("b2c"))  # (B, 2H)
        # ---- fused analytic backprop of d(sum F)/dz for both MLPs ----
        g2 = (1.0 - h2 * h2) * W("w3c")                                              # (B, 2H)
        g1 = (1.0 - h1 * h1) * jnp.dot(g2, W("w2cT"), preferred_element_type=f32)    # (B, 2H)
        # ---- decoder layer 1 (Msol, W1^T, wd1 pre-folded into wgd / bzd) ----
        hd = jnp.tanh(skip + jnp.dot(g1, W("wgd"), preferred_element_type=f32) + W("bzd"))
        # ---- decoder layer 2, lane-dense (pix_pad multiple of 128) store ----
        o_ref[...] = jnp.dot(hd, W("wd2p"), preferred_element_type=f32) + W("bd2p")

    return kernel


def _forward_impl(x, slab, layout, dims, tile_b):
    f32 = jnp.float32
    B, PIX = x.shape
    assert PIX == dims["PIX"]
    pix_pad = dims["pix_pad"]

    # Batch tiling: grid=1 for small B (v5e/v6e single TC); 256-row tiles for
    # large B so the "parallel" axis can split across v7x's two TensorCores.
    if tile_b is None:
        tile_b = B if B <= 512 else 256
    tile_b = max(8, _round_up(int(tile_b), 8))
    tile_b = min(tile_b, _round_up(B, 8))
    Bp = _round_up(B, tile_b)
    xp = x.astype(f32)
    if Bp != B:
        xp = jnp.pad(xp, ((0, Bp - B), (0, 0)))

    out = pl.pallas_call(
        _make_kernel(layout),
        out_shape=jax.ShapeDtypeStruct((Bp, pix_pad), f32),
        grid_spec=pltpu.PrefetchScalarGridSpec(
            num_scalar_prefetch=0,
            grid=(Bp // tile_b,),
            in_specs=[
                pl.BlockSpec((tile_b, PIX), lambda i: (i, 0)),
                # whole weight slab, constant index -> single DMA, resident in VMEM
                pl.BlockSpec(slab.shape, lambda i: (0, 0)),
            ],
            out_specs=pl.BlockSpec((tile_b, pix_pad), lambda i: (i, 0)),
        ),
        compiler_params=pltpu.CompilerParams(
            dimension_semantics=("parallel",),   # batch axis -> both TCs on v7x
        ),
    )(xp, slab)

    out = out[:, :PIX]
    return out[:B] if Bp != B else out


def make_pixel_hnn_forward(params, *, tile_b=None):
    """Fuse/pack the weights ONCE and return a jitted forward(x) closure, so
    per-call work is a single pallas_call dispatch (no host-side weight prep)."""
    slab, layout, dims = _pack_pixel_hnn_weights(params)
    slab = jax.device_put(slab)
    fwd = jax.jit(lambda x_, s_: _forward_impl(x_, s_, layout, dims, tile_b))
    return lambda x: fwd(x, slab)


# ---------------------------- pure-JAX reference ----------------------------
def _ref_forward(x, p):
    he = jnp.tanh(x @ p["we1"] + p["be1"])
    z = he @ p["we2"] + p["be2"]

    def scalar_mlp(zin, w1, b1, w2, b2, w3):
        h1 = jnp.tanh(zin @ w1 + b1)
        h2 = jnp.tanh(h1 @ w2 + b2)
        return jnp.sum(h2 * w3)   # sum of scalar outputs (final bias drops out of the grad)

    dF_h = jax.grad(scalar_mlp)(z, p["w1h"], p["b1h"], p["w2h"], p["b2h"], p["w3h"])
    d = z.shape[-1] // 2
    dHdq, dHdp = dF_h[:, :d], dF_h[:, d:]
    sol = jnp.concatenate([dHdp, -dHdq], axis=-1)
    con = jax.grad(scalar_mlp)(z, p["w1d"], p["b1d"], p["w2d"], p["b2d"], p["w3d"])
    z_next = z + sol + con
    hd = jnp.tanh(z_next @ p["wd1"] + p["bd1"])
    return hd @ p["wd2"] + p["bd2"]


def _make_params(key, pix_dim, ae_hidden, latent_dim, hnn_hidden):
    ks = iter(jax.random.split(key, 32))

    def lin(kin, fan_in, fan_out):
        scale = 1.0 / jnp.sqrt(jnp.float32(fan_in))
        w = jax.random.normal(kin, (fan_in, fan_out), jnp.float32) * scale
        b = jax.random.normal(next(ks), (1, fan_out), jnp.float32) * 0.01
        return w, b

    p = {}
    p["we1"], p["be1"] = lin(next(ks), pix_dim, ae_hidden)
    p["we2"], p["be2"] = lin(next(ks), ae_hidden, latent_dim)
    p["wd1"], p["bd1"] = lin(next(ks), latent_dim, ae_hidden)
    p["wd2"], p["bd2"] = lin(next(ks), ae_hidden, pix_dim)

    p["w1h"], p["b1h"] = lin(next(ks), latent_dim, hnn_hidden)
    p["w2h"], p["b2h"] = lin(next(ks), hnn_hidden, hnn_hidden)
    p["w3h"] = jax.random.normal(next(ks), (1, hnn_hidden), jnp.float32) / jnp.sqrt(
        jnp.float32(hnn_hidden))

    p["w1d"], p["b1d"] = lin(next(ks), latent_dim, hnn_hidden)
    p["w2d"], p["b2d"] = lin(next(ks), hnn_hidden, hnn_hidden)
    p["w3d"] = jax.random.normal(next(ks), (1, hnn_hidden), jnp.float32) / jnp.sqrt(
        jnp.float32(hnn_hidden))
    return p


if __name__ == "__main__":
    B = 256        # batch
    PIX = 64       # flattened pixel observation (e.g. 8x8)
    AE_H = 32      # autoencoder hidden width
    D = 8          # latent dim == PixelHNN input_dim (must be even)
    H = 32         # HNN MLP hidden_dim

    key = jax.random.PRNGKey(0)
    kx, kp = jax.random.split(key)
    x = jax.random.normal(kx, (B, PIX), jnp.float32)
    params = _make_params(kp, PIX, AE_H, D, H)

    forward = make_pixel_hnn_forward(params)          # weight fusion/packing done once here
    out = jax.block_until_ready(forward(x))
    ref = jax.block_until_ready(_ref_forward(x, params))

    assert out.shape == (B, PIX) and out.dtype == jnp.float32
    max_err = float(jnp.max(jnp.abs(out - ref)))
    assert jnp.allclose(out, ref, atol=1e-4, rtol=1e-4), (
        f"mismatch vs autodiff reference (max abs err {max_err:.3e})")
    print("KERNEL_OK")
</pallas_src>

<mosaic_0001>
module attributes {stable_mosaic.version = 11 : i64} {
  func.func @kernel(%arg0: i32, %arg1: memref<256x64xf32, #tpu.memory_space<vmem>>, %arg2: memref<400x128xf32, #tpu.memory_space<vmem>>, %arg3: memref<256x128xf32, #tpu.memory_space<vmem>>) attributes {dimension_semantics = [#tpu.dimension_semantics<parallel>], iteration_bounds = array<i64: 1>, scalar_prefetch = 0 : i64, scratch_operands = 0 : i64, tpu.core_type = #tpu.core_type<tc>, window_params = [{transform_indices = @transform_0, window_bounds = array<i64: 256, 64>}, {pipeline_mode = #tpu.pipeline_mode<synchronous>, transform_indices = @transform_1, window_bounds = array<i64: 400, 128>}, {transform_indices = @transform_2, window_bounds = array<i64: 256, 128>}]} {
    %c0 = arith.constant 0 : index
    %c0_0 = arith.constant 0 : index
    %0 = vector.load %arg1[%c0, %c0_0] : memref<256x64xf32, #tpu.memory_space<vmem>>, vector<256x64xf32>
    %c0_1 = arith.constant 0 : index
    %c0_2 = arith.constant 0 : index
    %1 = vector.load %arg2[%c0_1, %c0_2] : memref<400x128xf32, #tpu.memory_space<vmem>>, vector<64x32xf32>
    %cst = arith.constant dense<0.000000e+00> : vector<256x32xf32>
    %2 = tpu.matmul %0, %1, %cst {dimension_numbers = #tpu.dot_dimension_numbers<[1], [0], [0], [1], [0, 0, 1, 1], [], []>} : vector<256x64xf32>, vector<64x32xf32>, vector<256x32xf32> -> vector<256x32xf32>
    %c64 = arith.constant 64 : index
    %c0_3 = arith.constant 0 : index
    %3 = vector.load %arg2[%c64, %c0_3] : memref<400x128xf32, #tpu.memory_space<vmem>>, vector<1x32xf32>
    %4 = vector.broadcast %3 : vector<1x32xf32> to vector<256x32xf32>
    %5 = arith.addf %2, %4 : vector<256x32xf32>
    %6 = math.tanh %5 : vector<256x32xf32>
    %c256 = arith.constant 256 : index
    %c0_4 = arith.constant 0 : index
    %7 = vector.load %arg2[%c256, %c0_4] : memref<400x128xf32, #tpu.memory_space<vmem>>, vector<32x32xf32>
    %cst_5 = arith.constant dense<0.000000e+00> : vector<256x32xf32>
    %8 = tpu.matmul %6, %7, %cst_5 {dimension_numbers = #tpu.dot_dimension_numbers<[1], [0], [0], [1], [0, 0, 1, 1], [], []>} : vector<256x32xf32>, vector<32x32xf32>, vector<256x32xf32> -> vector<256x32xf32>
    %c72 = arith.constant 72 : index
    %c0_6 = arith.constant 0 : index
    %9 = vector.load %arg2[%c72, %c0_6] : memref<400x128xf32, #tpu.memory_space<vmem>>, vector<32x64xf32>
    %cst_7 = arith.constant dense<0.000000e+00> : vector<256x64xf32>
    %10 = tpu.matmul %6, %9, %cst_7 {dimension_numbers = #tpu.dot_dimension_numbers<[1], [0], [0], [1], [0, 0, 1, 1], [], []>} : vector<256x32xf32>, vector<32x64xf32>, vector<256x64xf32> -> vector<256x64xf32>
    %c104 = arith.constant 104 : index
    %c0_8 = arith.constant 0 : index
    %11 = vector.load %arg2[%c104, %c0_8] : memref<400x128xf32, #tpu.memory_space<vmem>>, vector<1x64xf32>
    %12 = vector.broadcast %11 : vector<1x64xf32> to vector<256x64xf32>
    %13 = arith.addf %10, %12 : vector<256x64xf32>
    %14 = math.tanh %13 : vector<256x64xf32>
    %c112 = arith.constant 112 : index
    %c0_9 = arith.constant 0 : index
    %15 = vector.load %arg2[%c112, %c0_9] : memref<400x128xf32, #tpu.memory_space<vmem>>, vector<64x64xf32>
    %cst_10 = arith.constant dense<0.000000e+00> : vector<256x64xf32>
    %16 = tpu.matmul %14, %15, %cst_10 {dimension_numbers = #tpu.dot_dimension_numbers<[1], [0], [0], [1], [0, 0, 1, 1], [], []>} : vector<256x64xf32>, vector<64x64xf32>, vector<256x64xf32> -> vector<256x64xf32>
    %c176 = arith.constant 176 : index
    %c0_11 = arith.constant 0 : index
    %17 = vector.load %arg2[%c176, %c0_11] : memref<400x128xf32, #tpu.memory_space<vmem>>, vector<1x64xf32>
    %18 = vector.broadcast %17 : vector<1x64xf32> to vector<256x64xf32>
    %19 = arith.addf %16, %18 : vector<256x64xf32>
    %20 = math.tanh %19 : vector<256x64xf32>
    %21 = arith.mulf %20, %20 : vector<256x64xf32>
    %cst_12 = arith.constant 1.000000e+00 : f32
    %22 = vector.broadcast %cst_12 : f32 to vector<256x64xf32>
    %23 = arith.subf %22, %21 : vector<256x64xf32>
    %c248 = arith.constant 248 : index
    %c0_13 = arith.constant 0 : index
    %24 = vector.load %arg2[%c248, %c0_13] : memref<400x128xf32, #tpu.memory_space<vmem>>, vector<1x64xf32>
    %25 = vector.broadcast %24 : vector<1x64xf32> to vector<256x64xf32>
    %26 = arith.mulf %23, %25 : vector<256x64xf32>
    %27 = arith.mulf %14, %14 : vector<256x64xf32>
    %cst_14 = arith.constant 1.000000e+00 : f32
    %28 = vector.broadcast %cst_14 : f32 to vector<256x64xf32>
    %29 = arith.subf %28, %27 : vector<256x64xf32>
    %c184 = arith.constant 184 : index
    %c0_15 = arith.constant 0 : index
    %30 = vector.load %arg2[%c184, %c0_15] : memref<400x128xf32, #tpu.memory_space<vmem>>, vector<64x64xf32>
    %cst_16 = arith.constant dense<0.000000e+00> : vector<256x64xf32>
    %31 = tpu.matmul %26, %30, %cst_16 {dimension_numbers = #tpu.dot_dimension_numbers<[1], [0], [0], [1], [0, 0, 1, 1], [], []>} : vector<256x64xf32>, vector<64x64xf32>, vector<256x64xf32> -> vector<256x64xf32>
    %32 = arith.mulf %29, %31 : vector<256x64xf32>
    %c296 = arith.constant 296 : index
    %c0_17 = arith.constant 0 : index
    %33 = vector.load %arg2[%c296, %c0_17] : memref<400x128xf32, #tpu.memory_space<vmem>>, vector<64x32xf32>
    %cst_18 = arith.constant dense<0.000000e+00> : vector<256x32xf32>
    %34 = tpu.matmul %32, %33, %cst_18 {dimension_numbers = #tpu.dot_dimension_numbers<[1], [0], [0], [1], [0, 0, 1, 1], [], []>} : vector<256x64xf32>, vector<64x32xf32>, vector<256x32xf32> -> vector<256x32xf32>
    %35 = arith.addf %8, %34 : vector<256x32xf32>
    %c288 = arith.constant 288 : index
    %c0_19 = arith.constant 0 : index
    %36 = vector.load %arg2[%c288, %c0_19] : memref<400x128xf32, #tpu.memory_space<vmem>>, vector<1x32xf32>
    %37 = vector.broadcast %36 : vector<1x32xf32> to vector<256x32xf32>
    %38 = arith.addf %35, %37 : vector<256x32xf32>
    %39 = math.tanh %38 : vector<256x32xf32>
    %c360 = arith.constant 360 : index
    %c0_20 = arith.constant 0 : index
    %40 = vector.load %arg2[%c360, %c0_20] : memref<400x128xf32, #tpu.memory_space<vmem>>, vector<32x128xf32>
    %cst_21 = arith.constant dense<0.000000e+00> : vector<256x128xf32>
    %41 = tpu.matmul %39, %40, %cst_21 {dimension_numbers = #tpu.dot_dimension_numbers<[1], [0], [0], [1], [0, 0, 1, 1], [], []>} : vector<256x32xf32>, vector<32x128xf32>, vector<256x128xf32> -> vector<256x128xf32>
    %c392 = arith.constant 392 : index
    %c0_22 = arith.constant 0 : index
    %42 = vector.load %arg2[%c392, %c0_22] : memref<400x128xf32, #tpu.memory_space<vmem>>, vector<1x128xf32>
    %43 = vector.broadcast %42 : vector<1x128xf32> to vector<256x128xf32>
    %44 = arith.addf %41, %43 : vector<256x128xf32>
    %c0_23 = arith.constant 0 : index
    %c0_24 = arith.constant 0 : index
    %45 = vector.load %arg3[%c0_23, %c0_24] : memref<256x128xf32, #tpu.memory_space<vmem>>, vector<256x128xf32>
    tpu.vector_store %arg3[%c0_23, %c0_24], %44 {strides = array<i32>} : memref<256x128xf32, #tpu.memory_space<vmem>>, vector<256x128xf32>,
    return
  }
  func.func @transform_0(%arg0: i32) -> (i32, i32) {
    %c0_i32 = arith.constant 0 : i32
    %c0_i32_0 = arith.constant 0 : i32
    return %arg0, %c0_i32 : i32, i32
  }
  func.func @transform_1(%arg0: i32) -> (i32, i32) {
    %c0_i32 = arith.constant 0 : i32
    %c0_i32_0 = arith.constant 0 : i32
    %c0_i32_1 = arith.constant 0 : i32
    return %c0_i32, %c0_i32_0 : i32, i32
  }
  func.func @transform_2(%arg0: i32) -> (i32, i32) {
    %c0_i32 = arith.constant 0 : i32
    %c0_i32_0 = arith.constant 0 : i32
    return %arg0, %c0_i32 : i32, i32
  }
}

</mosaic_0001>

<bundles_post_ra>
// kernel: _lambda_.1
= control target key start
LH: loop header
LB: loop body
LE: loop exit
PB: predicated region body
PF: predicated region fallthrough
CT: control target
= control target key end

     0   :  { %7 = vsyncpa [#allocation3], 0  ;;  %s3884_s9 = smov [#allocation2]   ;;  %s4851_s0 = inlined_call_operand.vmem [shape: f32[256,64], index: 0, kind: input, shape index: {}]   ;;  %s4852_s1 = inlined_call_operand.hbm [shape: f32[400,128], index: 1, kind: input, shape index: {}]   ;;  %s4853_s2 = inlined_call_operand.vmem [shape: f32[256,128], index: 2, kind: output, shape index: {}]  }
   0x1   :  { %s15_s10 = sshll.u32 %s3884_s9, 4  ;;  %s16_s10 = int_to_ptr.vmem [resolvable:$true] %s15_s10 }
   0x2   :  { %s3870_s11 = scalar_lea.vmem %s16_s10, 6400  ;;  %p3875_p1 = scmp.lt.s32.totalorder %s16_s10, %s16_s10 }
   0x3   :  { %p3871_p0 = scmp.ne.s32.totalorder %s16_s10, %s3870_s11  ;;  %p3876_p2 = scmp.lt.s32.totalorder %s3870_s11, %s3870_s11 }
   0x5   :  { %p3877_p3 = por %p3876_p2, %p3875_p1 }
   0x7   :  { %p3878_p4 = pnand %p3877_p3, %p3871_p0 }
   0x9   :  { %3881 = shalt.err (!%p3878_p4)
}
   0xa   :  { %s3885_s12 = smov 128   ;;  %s3886_s13 = smov 8  }
   0xb   :  { %21 = dma.hbm_to_vmem [thread:$0]  %s4852_s1, 6400, %s16_s10, [#allocation3], %s3885_s12, %s3885_s12, %s3886_s13  }
   0xc   :  { %3882 = dma.done.wait [#allocation3], 6400  }
   0xd   :  { %3883 = vsyncadd [#allocation3], 4294960896  ;;  %v64_v0 = vld [vmem:[#allocation2 + $0x38] sm:$0xff]  ;;  %v63_v1 = vld [vmem:[#allocation2 + $0x30] sm:$0xff]  ;;  %vm70_vm0 = vcmask 523264   ;;  %vm437_vm1 = vcmask 261120  }
   0xe   :  { %3171 = vmatprep.subr.mxu0 %v64_v0  ;;  %v62_v2 = vld [vmem:[#allocation2 + $0x28] sm:$0xff]  ;;  %v25_v3 = vld [vmem:[%s4851_s0] sm:$0xff]  ;;  %v60_v5 = vld [vmem:[#allocation2 + $0x18] sm:$0xff] }
   0xf   :  { %3172 = vmatpush3.msra.mxu0 %v64_v0  ;;  %3187 = vmatprep.mubr.msk.f32.mxu0 %vm70_vm0, %v25_v3  ;;  %v61_v4 = vld [vmem:[#allocation2 + $0x20] sm:$0xff]  ;;  %v59_v6 = vld [vmem:[#allocation2 + $0x10] sm:$0xff]  ;;  %v58_v7 = vld [vmem:[#allocation2 + $0x8] sm:$0xff] }
  0x10   :  { %3173 = vmatprep.subr.mxu0 %v63_v1  ;;  %v57_v8 = vld [vmem:[#allocation2] sm:$0xff]  ;;  %v26_v10 = vld [vmem:[%s4851_s0 + $0x8] sm:$0xff]  ;;  %v27_v11 = vld [vmem:[%s4851_s0 + $0x10] sm:$0xff] }
  0x11   :  { %3174 = vmatpush3.msra.mxu0 %v63_v1  ;;  %v431_v9 = vld [vmem:[#allocation2 + $0x60] sm:$0xff]  ;;  %v430_v12 = vld [vmem:[#allocation2 + $0x58] sm:$0xff]  ;;  %v429_v14 = vld [vmem:[#allocation2 + $0x50] sm:$0xff] }
  0x12   :  { %3175 = vmatprep.subr.mxu0 %v62_v2  ;;  %3595 = vmatprep.subr.mxu1 %v431_v9  ;;  %v28_v13 = vld [vmem:[%s4851_s0 + $0x18] sm:$0xff]  ;;  %v29_v15 = vld [vmem:[%s4851_s0 + $0x20] sm:$0xff]  ;;  %v30_v16 = vld [vmem:[%s4851_s0 + $0x28] sm:$0xff] }
  0x13   :  { %3176 = vmatpush3.msra.mxu0 %v62_v2  ;;  %3599 = vmatpush3.msra.mxu1 %v431_v9  ;;  %v31_v17 = vld [vmem:[%s4851_s0 + $0x30] sm:$0xff]  ;;  %v32_v18 = vld [vmem:[%s4851_s0 + $0x38] sm:$0xff]  ;;  %v33_v19 = vld [vmem:[%s4851_s0 + $0x40] sm:$0xff] }
  0x14   :  { %3177 = vmatprep.subr.mxu0 %v61_v4  ;;  %3596 = vmatprep.subr.mxu1 %v430_v12  ;;  %v34_v20 = vld [vmem:[%s4851_s0 + $0x48] sm:$0xff]  ;;  %v35_v21 = vld [vmem:[%s4851_s0 + $0x50] sm:$0xff]  ;;  %v36_v22 = vld [vmem:[%s4851_s0 + $0x58] sm:$0xff] }
  0x15   :  { %3178 = vmatpush3.msra.mxu0 %v61_v4  ;;  %3600 = vmatpush3.msra.mxu1 %v430_v12  ;;  %v37_v23 = vld [vmem:[%s4851_s0 + $0x60] sm:$0xff]  ;;  %v38_v24 = vld [vmem:[%s4851_s0 + $0x68] sm:$0xff]  ;;  %v39_v25 = vld [vmem:[%s4851_s0 + $0x70] sm:$0xff] }
  0x16   :  { %3179 = vmatprep.subr.mxu0 %v60_v5  ;;  %3597 = vmatprep.subr.mxu1 %v429_v14  ;;  %v40_v26 = vld [vmem:[%s4851_s0 + $0x78] sm:$0xff]  ;;  %v41_v27 = vld [vmem:[%s4851_s0 + $0x80] sm:$0xff]  ;;  %v42_v28 = vld [vmem:[%s4851_s0 + $0x88] sm:$0xff] }
  0x17   :  { %3180 = vmatpush3.msra.mxu0 %v60_v5  ;;  %3601 = vmatpush3.msra.mxu1 %v429_v14  ;;  %v43_v29 = vld [vmem:[%s4851_s0 + $0x90] sm:$0xff]  ;;  %v44_v30 = vld [vmem:[%s4851_s0 + $0x98] sm:$0xff]  ;;  %v45_v31 = vld [vmem:[%s4851_s0 + $0xa0] sm:$0xff] }
  0x18   :  { %3181 = vmatprep.subr.mxu0 %v59_v6  ;;  %v46_v32 = vld [vmem:[%s4851_s0 + $0xa8] sm:$0xff]  ;;  %v47_v33 = vld [vmem:[%s4851_s0 + $0xb0] sm:$0xff]  ;;  %v48_v34 = vld [vmem:[%s4851_s0 + $0xb8] sm:$0xff] }
  0x19   :  { %3182 = vmatpush3.msra.mxu0 %v59_v6  ;;  %v49_v35 = vld [vmem:[%s4851_s0 + $0xc0] sm:$0xff]  ;;  %v50_v36 = vld [vmem:[%s4851_s0 + $0xc8] sm:$0xff]  ;;  %v51_v37 = vld [vmem:[%s4851_s0 + $0xd0] sm:$0xff] }
  0x1a   :  { %3183 = vmatprep.subr.mxu0 %v58_v7  ;;  %v52_v38 = vld [vmem:[%s4851_s0 + $0xd8] sm:$0xff]  ;;  %v53_v39 = vld [vmem:[%s4851_s0 + $0xe0] sm:$0xff]  ;;  %v54_v40 = vld [vmem:[%s4851_s0 + $0xe8] sm:$0xff] }
  0x1b   :  { %3184 = vmatpush3.msra.mxu0 %v58_v7  ;;  %v55_v41 = vld [vmem:[%s4851_s0 + $0xf0] sm:$0xff]  ;;  %v56_v42 = vld [vmem:[%s4851_s0 + $0xf8] sm:$0xff]  ;;  %v428_v43 = vld [vmem:[#allocation2 + $0x48] sm:$0xff] }
  0x1c   :  { %3185 = vmatprep.subr.mxu0 %v57_v8  ;;  %3598 = vmatprep.subr.mxu1 %v428_v43  ;;  %v4033_v44 = vld [vmem:[#allocation2 + $0xa8] sm:$0xff]  ;;  %v4036_v45 = vld [vmem:[#allocation2 + $0x40] ss:$0 sm:$0xff] }
  0x1d   :  { %3186 = vmatpush3.msra.mxu0 %v57_v8  ;;  %3602 = vmatpush3.msra.mxu1 %v428_v43 }
  0x1e   :  { %3188 = vmatmul.mubr.msk.f32.vlgmr.msra.gmra.mxu0 %vm70_vm0, %v26_v10  ;;  %3235 = vmatprep.subr.mxu0 %v431_v9 }
  0x1f   :  { %3190 = vmatprep.mubr.msk.f32.mxu0 %vm70_vm0, %v27_v11  ;;  %3236 = vmatpush3.msra.mxu0 %v431_v9 }
  0x20   :  { %3237 = vmatprep.subr.mxu0 %v430_v12  ;;  %3291 = vmatprep.subr.mxu1 %v4033_v44 }
  0x21   :  { %3238 = vmatpush3.msra.mxu0 %v430_v12 }
  0x22   :  { %3191 = vmatmul.mubr.msk.f32.gmra.mxu0 %vm70_vm0, %v28_v13  ;;  %3239 = vmatprep.subr.mxu0 %v429_v14 }
  0x23   :  { %3193 = vmatprep.mubr.msk.f32.mxu0 %vm70_vm0, %v29_v15  ;;  %3240 = vmatpush3.msra.mxu0 %v429_v14 }
  0x24   :  { %3241 = vmatprep.subr.mxu0 %v428_v43 }
  0x25   :  { %3242 = vmatpush3.msra.mxu0 %v428_v43 }
  0x26   :  { %3194 = vmatmul.mubr.msk.f32.gmra.mxu0 %vm70_vm0, %v30_v16 }
  0x27   :  { %3196 = vmatprep.mubr.msk.f32.mxu0 %vm70_vm0, %v31_v17 }
  0x2a   :  { %3197 = vmatmul.mubr.msk.f32.gmra.mxu0 %vm70_vm0, %v32_v18 }
  0x2b   :  { %3199 = vmatprep.mubr.msk.f32.mxu0 %vm70_vm0, %v33_v19 }
  0x2e   :  { %3200 = vmatmul.mubr.msk.f32.gmra.mxu0 %vm70_vm0, %v34_v20 }
  0x2f   :  { %3202 = vmatprep.mubr.msk.f32.mxu0 %vm70_vm0, %v35_v21 }
  0x32   :  { %3203 = vmatmul.mubr.msk.f32.gmra.mxu0 %vm70_vm0, %v36_v22 }
  0x33   :  { %3205 = vmatprep.mubr.msk.f32.mxu0 %vm70_vm0, %v37_v23 }
  0x36   :  { %3206 = vmatmul.mubr.msk.f32.gmra.mxu0 %vm70_vm0, %v38_v24 }
  0x37   :  { %3208 = vmatprep.mubr.msk.f32.mxu0 %vm70_vm0, %v39_v25 }
  0x3a   :  { %3209 = vmatmul.mubr.msk.f32.gmra.mxu0 %vm70_vm0, %v40_v26 }
  0x3b   :  { %3211 = vmatprep.mubr.msk.f32.mxu0 %vm70_vm0, %v41_v27 }
  0x3e   :  { %3212 = vmatmul.mubr.msk.f32.gmra.mxu0 %vm70_vm0, %v42_v28 }
  0x3f   :  { %3214 = vmatprep.mubr.msk.f32.mxu0 %vm70_vm0, %v43_v29 }
  0x42   :  { %3215 = vmatmul.mubr.msk.f32.gmra.mxu0 %vm70_vm0, %v44_v30 }
  0x43   :  { %3217 = vmatprep.mubr.msk.f32.mxu0 %vm70_vm0, %v45_v31 }
  0x46   :  { %3218 = vmatmul.mubr.msk.f32.gmra.mxu0 %vm70_vm0, %v46_v32 }
  0x47   :  { %3220 = vmatprep.mubr.msk.f32.mxu0 %vm70_vm0, %v47_v33 }
  0x4a   :  { %3221 = vmatmul.mubr.msk.f32.gmra.mxu0 %vm70_vm0, %v48_v34 }
  0x4b   :  { %3223 = vmatprep.mubr.msk.f32.mxu0 %vm70_vm0, %v49_v35 }
  0x4e   :  { %3224 = vmatmul.mubr.msk.f32.gmra.mxu0 %vm70_vm0, %v50_v36 }
  0x4f   :  { %3226 = vmatprep.mubr.msk.f32.mxu0 %vm70_vm0, %v51_v37 }
  0x52   :  { %3227 = vmatmul.mubr.msk.f32.gmra.mxu0 %vm70_vm0, %v52_v38 }
  0x53   :  { %3229 = vmatprep.mubr.msk.f32.mxu0 %vm70_vm0, %v53_v39 }
  0x56   :  { %3230 = vmatmul.mubr.msk.f32.gmra.mxu0 %vm70_vm0, %v54_v40 }
  0x57   :  { %3232 = vmatprep.mubr.msk.f32.mxu0 %vm70_vm0, %v55_v41 }
  0x5a   :  { %3233 = vmatmul.mubr.msk.f32.gmra.mxu0 %vm70_vm0, %v56_v42 }
  0xde   :  { %v3189_v46 = vpop.f32.mrf.mxu0 }
  0xdf   :  { %v239_v47 = vadd.f32 %v3189_v46, %v4036_v45 }
  0xe0   :  { %v233_v48 = vpop.f32.mrf.mxu0 }
  0xe1   :  { %v234_v49 = vadd.f32 %v4036_v45, %v233_v48  ;;  %v797_v48 = vld [vmem:[#allocation2 + $0xa0] sm:$0xff] }
  0xe2   :  { %v3192_v50 = vpop.f32.mrf.mxu0 }
  0xe3   :  { %3606 = vtanh.f32 %v234_v49  ;;  %v249_v51 = vadd.f32 %v3192_v50, %v4036_v45  ;;  %v796_v50 = vld [vmem:[#allocation2 + $0x98] sm:$0xff] }
  0xe4   :  { %3608 = vtanh.f32 %v239_v47  ;;  %v243_v52 = vpop.f32.mrf.mxu0 }
  0xe5   :  { %v244_v53 = vadd.f32 %v4036_v45, %v243_v52 }
  0xe6   :  { %v3195_v54 = vpop.f32.mrf.mxu0 }
  0xe7   :  { %3610 = vtanh.f32 %v244_v53  ;;  %v259_v55 = vadd.f32 %v3195_v54, %v4036_v45 }
  0xe8   :  { %3612 = vtanh.f32 %v249_v51  ;;  %v253_v56 = vpop.f32.mrf.mxu0 }
  0xe9   :  { %v254_v57 = vadd.f32 %v4036_v45, %v253_v56  ;;  %v795_v56 = vld [vmem:[#allocation2 + $0x90] sm:$0xff] }
  0xea   :  { %v3198_v58 = vpop.f32.mrf.mxu0 }
  0xeb   :  { %3614 = vtanh.f32 %v254_v57  ;;  %v269_v59 = vadd.f32 %v3198_v58, %v4036_v45 }
  0xec   :  { %3616 = vtanh.f32 %v259_v55  ;;  %v263_v60 = vpop.f32.mrf.mxu0 }
  0xed   :  { %v264_v61 = vadd.f32 %v4036_v45, %v263_v60 }
  0xee   :  { %v3201_v62 = vpop.f32.mrf.mxu0 }
  0xef   :  { %3618 = vtanh.f32 %v264_v61  ;;  %v279_v0 = vadd.f32 %v3201_v62, %v4036_v45 }
  0xf0   :  { %v4046_v63 = vpop.eup %3606  ;;  %3620 = vtanh.f32 %v269_v59  ;;  %v273_v1 = vpop.f32.mrf.mxu0 }
  0xf1   :  { %v4049_v2 = vpop.eup %3608  ;;  %v274_v3 = vadd.f32 %v4036_v45, %v273_v1  ;;  %3243 = vmatprep.mubr.msk.f32.mxu0 %vm437_vm1, %v4046_v63 }
  0xf2   :  { %v3204_v4 = vpop.f32.mrf.mxu0  ;;  %3244 = vmatmul.mubr.msk.f32.vlgmr.msra.gmra.mxu0 %vm437_vm1, %v4049_v2 }
  0xf3   :  { %3622 = vtanh.f32 %v274_v3  ;;  %v289_v6 = vadd.f32 %v3204_v4, %v4036_v45 }
  0xf4   :  { %v4056_v5 = vpop.eup %3610  ;;  %3624 = vtanh.f32 %v279_v0  ;;  %v283_v7 = vpop.f32.mrf.mxu0 }
  0xf5   :  { %v4059_v8 = vpop.eup %3612  ;;  %v284_v9 = vadd.f32 %v4036_v45, %v283_v7  ;;  %3246 = vmatprep.mubr.msk.f32.mxu0 %vm437_vm1, %v4056_v5 }
  0xf6   :  { %v3207_v10 = vpop.f32.mrf.mxu0  ;;  %3247 = vmatmul.mubr.msk.f32.gmra.mxu0 %vm437_vm1, %v4059_v8 }
  0xf7   :  { %3626 = vtanh.f32 %v284_v9  ;;  %v299_v12 = vadd.f32 %v3207_v10, %v4036_v45 }
  0xf8   :  { %v4066_v11 = vpop.eup %3614  ;;  %3628 = vtanh.f32 %v289_v6  ;;  %v293_v13 = vpop.f32.mrf.mxu0 }
  0xf9   :  { %v4069_v14 = vpop.eup %3616  ;;  %v294_v15 = vadd.f32 %v4036_v45, %v293_v13  ;;  %3249 = vmatprep.mubr.msk.f32.mxu0 %vm437_vm1, %v4066_v11 }
  0xfa   :  { %v3210_v16 = vpop.f32.mrf.mxu0  ;;  %3250 = vmatmul.mubr.msk.f32.gmra.mxu0 %vm437_vm1, %v4069_v14 }
  0xfb   :  { %3630 = vtanh.f32 %v294_v15  ;;  %v309_v18 = vadd.f32 %v3210_v16, %v4036_v45 }
  0xfc   :  { %v4076_v17 = vpop.eup %3618  ;;  %3632 = vtanh.f32 %v299_v12  ;;  %v303_v19 = vpop.f32.mrf.mxu0 }
  0xfd   :  { %v4079_v20 = vpop.eup %3620  ;;  %v304_v21 = vadd.f32 %v4036_v45, %v303_v19  ;;  %3252 = vmatprep.mubr.msk.f32.mxu0 %vm437_vm1, %v4076_v17 }
  0xfe   :  { %v3213_v22 = vpop.f32.mrf.mxu0  ;;  %3253 = vmatmul.mubr.msk.f32.gmra.mxu0 %vm437_vm1, %v4079_v20 }
  0xff   :  { %3634 = vtanh.f32 %v304_v21  ;;  %v319_v24 = vadd.f32 %v3213_v22, %v4036_v45 }
 0x100   :  { %v4086_v23 = vpop.eup %3622  ;;  %3636 = vtanh.f32 %v309_v18  ;;  %v313_v25 = vpop.f32.mrf.mxu0 }
 0x101   :  { %v4089_v26 = vpop.eup %3624  ;;  %v314_v27 = vadd.f32 %v4036_v45, %v313_v25  ;;  %3255 = vmatprep.mubr.msk.f32.mxu0 %vm437_vm1, %v4086_v23 }
 0x102   :  { %v3216_v28 = vpop.f32.mrf.mxu0  ;;  %3256 = vmatmul.mubr.msk.f32.gmra.mxu0 %vm437_vm1, %v4089_v26 }
 0x103   :  { %3638 = vtanh.f32 %v314_v27  ;;  %v329_v30 = vadd.f32 %v3216_v28, %v4036_v45  ;;  %v794_v27 = vld [vmem:[#allocation2 + $0x88] sm:$0xff]  ;;  %v793_v28 = vld [vmem:[#allocation2 + $0x80] sm:$0xff] }
 0x104   :  { %v4096_v29 = vpop.eup %3626  ;;  %3640 = vtanh.f32 %v319_v24  ;;  %v323_v31 = vpop.f32.mrf.mxu0 }
 0x105   :  { %v4099_v32 = vpop.eup %3628  ;;  %v324_v33 = vadd.f32 %v4036_v45, %v323_v31  ;;  %3258 = vmatprep.mubr.msk.f32.mxu0 %vm437_vm1, %v4096_v29  ;;  %v791_v31 = vld [vmem:[#allocation2 + $0x70] sm:$0xff] }
 0x106   :  { %v3219_v34 = vpop.f32.mrf.mxu0  ;;  %3259 = vmatmul.mubr.msk.f32.gmra.mxu0 %vm437_vm1, %v4099_v32 }
 0x107   :  { %3642 = vtanh.f32 %v324_v33  ;;  %v339_v36 = vadd.f32 %v3219_v34, %v4036_v45  ;;  %v1329_v33 = vld [vmem:[#allocation2 + $0xf0] sm:$0xff]  ;;  %v4199_v34 = vld [vmem:[#allocation2 + $0x68] ss:$0 sm:$0xff] }
 0x108   :  { %v4106_v35 = vpop.eup %3630  ;;  %3644 = vtanh.f32 %v329_v30  ;;  %v333_v37 = vpop.f32.mrf.mxu0  ;;  %v792_v30 = vld [vmem:[#allocation2 + $0x78] sm:$0xff]  ;;  %3355 = vmatprep.subr.mxu0 %v1329_v33 }
 0x109   :  { %v4109_v38 = vpop.eup %3632  ;;  %v334_v39 = vadd.f32 %v4036_v45, %v333_v37  ;;  %3261 = vmatprep.mubr.msk.f32.mxu0 %vm437_vm1, %v4106_v35  ;;  %3356 = vmatpush3.msra.mxu0 %v1329_v33 }
 0x10a   :  { %v3222_v40 = vpop.f32.mrf.mxu0  ;;  %3262 = vmatmul.mubr.msk.f32.gmra.mxu0 %vm437_vm1, %v4109_v38 }
 0x10b   :  { %3646 = vtanh.f32 %v334_v39  ;;  %v349_v42 = vadd.f32 %v3222_v40, %v4036_v45 }
 0x10c   :  { %v4116_v41 = vpop.eup %3634  ;;  %3648 = vtanh.f32 %v339_v36  ;;  %v343_v43 = vpop.f32.mrf.mxu0 }
 0x10d   :  { %v4119_v46 = vpop.eup %3636  ;;  %v344_v47 = vadd.f32 %v4036_v45, %v343_v43  ;;  %3264 = vmatprep.mubr.msk.f32.mxu1 %vm437_vm1, %v4116_v41 }
 0x10e   :  { %v3225_v49 = vpop.f32.mrf.mxu0  ;;  %3265 = vmatmul.mubr.msk.f32.vlgmr.msra.gmra.mxu1 %vm437_vm1, %v4119_v46 }
 0x10f   :  { %3650 = vtanh.f32 %v344_v47  ;;  %3292 = vmatpush3.msra.mxu1 %v4033_v44  ;;  %v359_v52 = vadd.f32 %v3225_v49, %v4036_v45 }
 0x110   :  { %v4127_v51 = vpop.eup %3638  ;;  %3652 = vtanh.f32 %v349_v42  ;;  %v353_v53 = vpop.f32.mrf.mxu0  ;;  %3293 = vmatprep.subr.mxu1 %v797_v48 }
 0x111   :  { %v4130_v54 = vpop.eup %3640  ;;  %v354_v55 = vadd.f32 %v4036_v45, %v353_v53  ;;  %3267 = vmatprep.mubr.msk.f32.mxu1 %vm437_vm1, %v4127_v51  ;;  %3294 = vmatpush3.msra.mxu1 %v797_v48 }
 0x112   :  { %v3228_v57 = vpop.f32.mrf.mxu0  ;;  %3268 = vmatmul.mubr.msk.f32.gmra.mxu1 %vm437_vm1, %v4130_v54  ;;  %3295 = vmatprep.subr.mxu1 %v796_v50 }
 0x113   :  { %3654 = vtanh.f32 %v354_v55  ;;  %3296 = vmatpush3.msra.mxu1 %v796_v50  ;;  %v369_v58 = vadd.f32 %v3228_v57, %v4036_v45 }
 0x114   :  { %v4137_v44 = vpop.eup %3642  ;;  %3656 = vtanh.f32 %v359_v52  ;;  %v363_v59 = vpop.f32.mrf.mxu0  ;;  %3297 = vmatprep.subr.mxu1 %v795_v56 }
 0x115   :  { %v4140_v60 = vpop.eup %3644  ;;  %v364_v61 = vadd.f32 %v4036_v45, %v363_v59  ;;  %3270 = vmatprep.mubr.msk.f32.mxu1 %vm437_vm1, %v4137_v44  ;;  %3298 = vmatpush3.msra.mxu1 %v795_v56 }
 0x116   :  { %v3231_v62 = vpop.f32.mrf.mxu0  ;;  %3271 = vmatmul.mubr.msk.f32.gmra.mxu1 %vm437_vm1, %v4140_v60  ;;  %3299 = vmatprep.subr.mxu1 %v794_v27 }
 0x117   :  { %3658 = vtanh.f32 %v364_v61  ;;  %v379_v1 = vadd.f32 %v3231_v62, %v4036_v45  ;;  %3300 = vmatpush3.msra.mxu1 %v794_v27 }
 0x118   :  { %v4147_v0 = vpop.eup %3646  ;;  %3660 = vtanh.f32 %v369_v58  ;;  %v373_v3 = vpop.f32.mrf.mxu0  ;;  %3301 = vmatprep.subr.mxu1 %v793_v28 }
 0x119   :  { %v4150_v4 = vpop.eup %3648  ;;  %v374_v6 = vadd.f32 %v4036_v45, %v373_v3  ;;  %3273 = vmatprep.mubr.msk.f32.mxu1 %vm437_vm1, %v4147_v0  ;;  %3302 = vmatpush3.msra.mxu1 %v793_v28 }
 0x11a   :  { %v3234_v7 = vpop.f32.mrf.mxu0  ;;  %3274 = vmatmul.mubr.msk.f32.gmra.mxu1 %vm437_vm1, %v4150_v4  ;;  %3303 = vmatprep.subr.mxu1 %v792_v30 }
 0x11b   :  { %3662 = vtanh.f32 %v374_v6  ;;  %v389_v10 = vadd.f32 %v3234_v7, %v4036_v45  ;;  %3304 = vmatpush3.msra.mxu1 %v792_v30 }
 0x11c   :  { %v4157_v9 = vpop.eup %3650  ;;  %3664 = vtanh.f32 %v379_v1  ;;  %v383_v12 = vpop.f32.mrf.mxu0  ;;  %3305 = vmatprep.subr.mxu1 %v791_v31 }
 0x11d   :  { %v4160_v13 = vpop.eup %3652  ;;  %v384_v15 = vadd.f32 %v4036_v45, %v383_v12  ;;  %3276 = vmatprep.mubr.msk.f32.mxu1 %vm437_vm1, %v4157_v9  ;;  %3306 = vmatpush3.msra.mxu1 %v791_v31 }
 0x11e   :  { %3277 = vmatmul.mubr.msk.f32.gmra.mxu1 %vm437_vm1, %v4160_v13 }
 0x11f   :  { %3666 = vtanh.f32 %v384_v15 }
 0x120   :  { %v4167_v16 = vpop.eup %3654  ;;  %3668 = vtanh.f32 %v389_v10 }
 0x121   :  { %v4169_v18 = vpop.eup %3656  ;;  %3279 = vmatprep.mubr.msk.f32.mxu1 %vm437_vm1, %v4167_v16 }
 0x122   :  { %3280 = vmatmul.mubr.msk.f32.gmra.mxu1 %vm437_vm1, %v4169_v18 }
 0x124   :  { %v4175_v19 = vpop.eup %3658 }
 0x125   :  { %v4177_v45 = vpop.eup %3660  ;;  %3282 = vmatprep.mubr.msk.f32.mxu1 %vm437_vm1, %v4175_v19 }
 0x126   :  { %3283 = vmatmul.mubr.msk.f32.gmra.mxu1 %vm437_vm1, %v4177_v45 }
 0x128   :  { %v4183_v21 = vpop.eup %3662 }
 0x129   :  { %v4185_v22 = vpop.eup %3664  ;;  %3285 = vmatprep.mubr.msk.f32.mxu1 %vm437_vm1, %v4183_v21 }
 0x12a   :  { %3286 = vmatmul.mubr.msk.f32.gmra.mxu1 %vm437_vm1, %v4185_v22 }
 0x12c   :  { %v4191_v24 = vpop.eup %3666 }
 0x12d   :  { %v4193_v25 = vpop.eup %3668  ;;  %3288 = vmatprep.mubr.msk.f32.mxu1 %vm437_vm1, %v4191_v24 }
 0x12e   :  { %3289 = vmatmul.mubr.msk.f32.gmra.mxu1 %vm437_vm1, %v4193_v25 }
 0x1b2   :  { %v3245_v36 = vpop.f32.mrf.mxu0 }
 0x1b3   :  { %v606_v37 = vadd.f32 %v3245_v36, %v4199_v34 }
 0x1b4   :  { %v600_v39 = vpop.f32.mrf.mxu0 }
 0x1b5   :  { %v601_v40 = vadd.f32 %v4199_v34, %v600_v39 }
 0x1b6   :  { %v3248_v42 = vpop.f32.mrf.mxu0 }
 0x1b7   :  { %3670 = vtanh.f32 %v601_v40  ;;  %v616_v43 = vadd.f32 %v3248_v42, %v4199_v34 }
 0x1b8   :  { %3672 = vtanh.f32 %v606_v37  ;;  %v610_v47 = vpop.f32.mrf.mxu0 }
 0x1b9   :  { %v611_v48 = vadd.f32 %v4199_v34, %v610_v47 }
 0x1ba   :  { %v3251_v49 = vpop.f32.mrf.mxu0 }
 0x1bb   :  { %3674 = vtanh.f32 %v611_v48  ;;  %v626_v50 = vadd.f32 %v3251_v49, %v4199_v34 }
 0x1bc   :  { %3676 = vtanh.f32 %v616_v43  ;;  %v620_v52 = vpop.f32.mrf.mxu0 }
 0x1bd   :  { %v621_v53 = vadd.f32 %v4199_v34, %v620_v52 }
 0x1be   :  { %v3254_v55 = vpop.f32.mrf.mxu0 }
 0x1bf   :  { %3678 = vtanh.f32 %v621_v53  ;;  %v636_v56 = vadd.f32 %v3254_v55, %v4199_v34 }
 0x1c0   :  { %3680 = vtanh.f32 %v626_v50  ;;  %v630_v57 = vpop.f32.mrf.mxu0 }
 0x1c1   :  { %v631_v58 = vadd.f32 %v4199_v34, %v630_v57 }
 0x1c2   :  { %v3257_v59 = vpop.f32.mrf.mxu0 }
 0x1c3   :  { %3682 = vtanh.f32 %v631_v58  ;;  %v646_v62 = vadd.f32 %v3257_v59, %v4199_v34 }
 0x1c4   :  { %v4209_v61 = vpop.eup %3670  ;;  %3684 = vtanh.f32 %v636_v56  ;;  %v640_v1 = vpop.f32.mrf.mxu0 }
 0x1c5   :  { %v4212_v3 = vpop.eup %3672  ;;  %v641_v6 = vadd.f32 %v4199_v34, %v640_v1  ;;  %3307 = vmatprep.mubr.msk.f32.mxu1 %vm70_vm0, %v4209_v61 }
 0x1c6   :  { %v3260_v7 = vpop.f32.mrf.mxu0  ;;  %3308 = vmatmul.mubr.msk.f32.vlgmr.msra.gmra.mxu1 %vm70_vm0, %v4212_v3 }
 0x1c7   :  { %3686 = vtanh.f32 %v641_v6  ;;  %v656_v12 = vadd.f32 %v3260_v7, %v4199_v34 }
 0x1c8   :  { %v4219_v10 = vpop.eup %3674  ;;  %3688 = vtanh.f32 %v646_v62  ;;  %v650_v15 = vpop.f32.mrf.mxu0 }
 0x1c9   :  { %v4222_v27 = vpop.eup %3676  ;;  %v651_v28 = vadd.f32 %v4199_v34, %v650_v15  ;;  %3310 = vmatprep.mubr.msk.f32.mxu1 %vm70_vm0, %v4219_v10 }
 0x1ca   :  { %v3263_v30 = vpop.f32.mrf.mxu0  ;;  %3311 = vmatmul.mubr.msk.f32.gmra.mxu1 %vm70_vm0, %v4222_v27 }
 0x1cb   :  { %3690 = vtanh.f32 %v651_v28  ;;  %v666_v33 = vadd.f32 %v3263_v30, %v4199_v34 }
 0x1cc   :  { %v4229_v31 = vpop.eup %3678  ;;  %3692 = vtanh.f32 %v656_v12  ;;  %v660_v36 = vpop.f32.mrf.mxu0 }
 0x1cd   :  { %v4232_v37 = vpop.eup %3680  ;;  %v661_v39 = vadd.f32 %v4199_v34, %v660_v36  ;;  %3313 = vmatprep.mubr.msk.f32.mxu1 %vm70_vm0, %v4229_v31 }
 0x1ce   :  { %v3266_v40 = vpop.f32.mrf.mxu1  ;;  %3314 = vmatmul.mubr.msk.f32.gmra.mxu1 %vm70_vm0, %v4232_v37 }
 0x1cf   :  { %3694 = vtanh.f32 %v661_v39  ;;  %v676_v43 = vadd.f32 %v3266_v40, %v4199_v34 }
 0x1d0   :  { %v4239_v42 = vpop.eup %3682  ;;  %3696 = vtanh.f32 %v666_v33  ;;  %v670_v47 = vpop.f32.mrf.mxu1 }
 0x1d1   :  { %v4242_v48 = vpop.eup %3684  ;;  %v671_v49 = vadd.f32 %v4199_v34, %v670_v47  ;;  %3316 = vmatprep.mubr.msk.f32.mxu1 %vm70_vm0, %v4239_v42 }
 0x1d2   :  { %v3269_v50 = vpop.f32.mrf.mxu1  ;;  %3317 = vmatmul.mubr.msk.f32.gmra.mxu1 %vm70_vm0, %v4242_v48 }
 0x1d3   :  { %3698 = vtanh.f32 %v671_v49  ;;  %v686_v53 = vadd.f32 %v3269_v50, %v4199_v34 }
 0x1d4   :  { %v4249_v52 = vpop.eup %3686  ;;  %3700 = vtanh.f32 %v676_v43  ;;  %v680_v55 = vpop.f32.mrf.mxu1 }
 0x1d5   :  { %v4252_v56 = vpop.eup %3688  ;;  %v681_v57 = vadd.f32 %v4199_v34, %v680_v55  ;;  %3319 = vmatprep.mubr.msk.f32.mxu1 %vm70_vm0, %v4249_v52 }
 0x1d6   :  { %4877 = vst [vmem:[#allocation5_spill] sm:$0xff] %v4252_v56  ;;  %v3272_v58 = vpop.f32.mrf.mxu1  ;;  %3320 = vmatmul.mubr.msk.f32.gmra.mxu1 %vm70_vm0, %v4252_v56 }
 0x1d7   :  { %3702 = vtanh.f32 %v681_v57  ;;  %v696_v62 = vadd.f32 %v3272_v58, %v4199_v34 }
 0x1d8   :  { %v4259_v59 = vpop.eup %3690  ;;  %3704 = vtanh.f32 %v686_v53  ;;  %v690_v1 = vpop.f32.mrf.mxu1 }
 0x1d9   :  { %4878 = vst [vmem:[#allocation6_spill] sm:$0xff] %v4259_v59  ;;  %v4262_v6 = vpop.eup %3692  ;;  %v691_v7 = vadd.f32 %v4199_v34, %v690_v1  ;;  %3322 = vmatprep.mubr.msk.f32.mxu1 %vm70_vm0, %v4259_v59 }
 0x1da   :  { %4879 = vst [vmem:[#allocation7_spill] sm:$0xff] %v4262_v6  ;;  %v3275_v12 = vpop.f32.mrf.mxu1  ;;  %3323 = vmatmul.mubr.msk.f32.gmra.mxu1 %vm70_vm0, %v4262_v6 }
 0x1db   :  { %3706 = vtanh.f32 %v691_v7  ;;  %v706_v28 = vadd.f32 %v3275_v12, %v4199_v34 }
 0x1dc   :  { %v4269_v15 = vpop.eup %3694  ;;  %3708 = vtanh.f32 %v696_v62  ;;  %v700_v30 = vpop.f32.mrf.mxu1 }
 0x1dd   :  { %4880 = vst [vmem:[#allocation8_spill] sm:$0xff] %v4269_v15  ;;  %v4272_v33 = vpop.eup %3696  ;;  %v701_v36 = vadd.f32 %v4199_v34, %v700_v30  ;;  %3325 = vmatprep.mubr.msk.f32.mxu1 %vm70_vm0, %v4269_v15  ;;  %v1689_v15 = vld [vmem:[#allocation2 + $0x158] sm:$0xff] }
 0x1de   :  { %4881 = vst [vmem:[#allocation9_spill] sm:$0xff] %v4272_v33  ;;  %v3278_v39 = vpop.f32.mrf.mxu1  ;;  %3326 = vmatmul.mubr.msk.f32.gmra.mxu1 %vm70_vm0, %v4272_v33 }
 0x1df   :  { %3710 = vtanh.f32 %v701_v36  ;;  %v716_v43 = vadd.f32 %v3278_v39, %v4199_v34 }
 0x1e0   :  { %v4279_v40 = vpop.eup %3698  ;;  %3712 = vtanh.f32 %v706_v28  ;;  %v710_v47 = vpop.f32.mrf.mxu1 }
 0x1e1   :  { %4882 = vst [vmem:[#allocation10_spill] sm:$0xff] %v4279_v40  ;;  %v4282_v49 = vpop.eup %3700  ;;  %v711_v50 = vadd.f32 %v4199_v34, %v710_v47  ;;  %3328 = vmatprep.mubr.msk.f32.mxu1 %vm70_vm0, %v4279_v40 }
 0x1e2   :  { %4883 = vst [vmem:[#allocation11_spill] sm:$0xff] %v4282_v49  ;;  %v3281_v53 = vpop.f32.mrf.mxu1  ;;  %3329 = vmatmul.mubr.msk.f32.gmra.mxu1 %vm70_vm0, %v4282_v49 }
 0x1e3   :  { %3714 = vtanh.f32 %v711_v50  ;;  %v726_v57 = vadd.f32 %v3281_v53, %v4199_v34 }
 0x1e4   :  { %v4289_v55 = vpop.eup %3702  ;;  %3716 = vtanh.f32 %v716_v43  ;;  %v720_v58 = vpop.f32.mrf.mxu1 }
 0x1e5   :  { %4884 = vst [vmem:[#allocation12_spill] sm:$0xff] %v4289_v55  ;;  %v4292_v62 = vpop.eup %3704  ;;  %v721_v1 = vadd.f32 %v4199_v34, %v720_v58  ;;  %3331 = vmatprep.mubr.msk.f32.mxu1 %vm70_vm0, %v4289_v55 }
 0x1e6   :  { %4885 = vst [vmem:[#allocation13_spill] sm:$0xff] %v4292_v62  ;;  %v3284_v7 = vpop.f32.mrf.mxu1  ;;  %3332 = vmatmul.mubr.msk.f32.gmra.mxu1 %vm70_vm0, %v4292_v62 }
 0x1e7   :  { %3718 = vtanh.f32 %v721_v1  ;;  %v736_v28 = vadd.f32 %v3284_v7, %v4199_v34 }
 0x1e8   :  { %v4299_v12 = vpop.eup %3706  ;;  %3720 = vtanh.f32 %v726_v57  ;;  %v730_v30 = vpop.f32.mrf.mxu1 }
 0x1e9   :  { %4886 = vst [vmem:[#allocation14_spill] sm:$0xff] %v4299_v12  ;;  %v4302_v36 = vpop.eup %3708  ;;  %v731_v39 = vadd.f32 %v4199_v34, %v730_v30  ;;  %3334 = vmatprep.mubr.msk.f32.mxu1 %vm70_vm0, %v4299_v12 }
 0x1ea   :  { %4887 = vst [vmem:[#allocation15_spill] sm:$0xff] %v4302_v36  ;;  %v3287_v43 = vpop.f32.mrf.mxu1  ;;  %3335 = vmatmul.mubr.msk.f32.gmra.mxu1 %vm70_vm0, %v4302_v36 }
 0x1eb   :  { %3722 = vtanh.f32 %v731_v39  ;;  %v746_v50 = vadd.f32 %v3287_v43, %v4199_v34 }
 0x1ec   :  { %v4309_v47 = vpop.eup %3710  ;;  %3724 = vtanh.f32 %v736_v28  ;;  %v740_v53 = vpop.f32.mrf.mxu1 }
 0x1ed   :  { %4888 = vst [vmem:[#allocation16_spill] sm:$0xff] %v4309_v47  ;;  %v4312_v57 = vpop.eup %3712  ;;  %v741_v58 = vadd.f32 %v4199_v34, %v740_v53  ;;  %3337 = vmatprep.mubr.msk.f32.mxu1 %vm70_vm0, %v4309_v47 }
 0x1ee   :  { %4889 = vst [vmem:[#allocation17_spill] sm:$0xff] %v4312_v57  ;;  %v3290_v1 = vpop.f32.mrf.mxu1  ;;  %3338 = vmatmul.mubr.msk.f32.gmra.mxu1 %vm70_vm0, %v4312_v57 }
 0x1ef   :  { %3726 = vtanh.f32 %v741_v58  ;;  %v756_v28 = vadd.f32 %v3290_v1, %v4199_v34 }
 0x1f0   :  { %v4319_v7 = vpop.eup %3714  ;;  %3728 = vtanh.f32 %v746_v50  ;;  %v750_v30 = vpop.f32.mrf.mxu1 }
 0x1f1   :  { %4890 = vst [vmem:[#allocation18_spill] sm:$0xff] %v4319_v7  ;;  %v4322_v39 = vpop.eup %3716  ;;  %v751_v43 = vadd.f32 %v4199_v34, %v750_v30  ;;  %3340 = vmatprep.mubr.msk.f32.mxu1 %vm70_vm0, %v4319_v7 }
 0x1f2   :  { %4891 = vst [vmem:[#allocation19_spill] sm:$0xff] %v4322_v39  ;;  %3341 = vmatmul.mubr.msk.f32.gmra.mxu1 %vm70_vm0, %v4322_v39 }
 0x1f3   :  { %3730 = vtanh.f32 %v751_v43 }
 0x1f4   :  { %v4329_v53 = vpop.eup %3718  ;;  %3732 = vtanh.f32 %v756_v28 }
 0x1f5   :  { %4892 = vst [vmem:[#allocation20_spill] sm:$0xff] %v4329_v53  ;;  %v4331_v58 = vpop.eup %3720  ;;  %3343 = vmatprep.mubr.msk.f32.mxu1 %vm70_vm0, %v4329_v53  ;;  %v1323_v53 = vld [vmem:[#allocation2 + $0xc0] sm:$0xff] }
 0x1f6   :  { %4893 = vst [vmem:[#allocation21_spill] sm:$0xff] %v4331_v58  ;;  %3344 = vmatmul.mubr.msk.f32.gmra.mxu1 %vm70_vm0, %v4331_v58  ;;  %v1324_v58 = vld [vmem:[#allocation2 + $0xc8] sm:$0xff] }
 0x1f8   :  { %v4337_v50 = vpop.eup %3722 }
 0x1f9   :  { %4894 = vst [vmem:[#allocation22_spill] sm:$0xff] %v4337_v50  ;;  %v4339_v34 = vpop.eup %3724  ;;  %3346 = vmatprep.mubr.msk.f32.mxu1 %vm70_vm0, %v4337_v50  ;;  %v1327_v50 = vld [vmem:[#allocation2 + $0xe0] sm:$0xff] }
 0x1fa   :  { %4895 = vst [vmem:[#allocation23_spill] sm:$0xff] %v4339_v34  ;;  %3347 = vmatmul.mubr.msk.f32.gmra.mxu1 %vm70_vm0, %v4339_v34  ;;  %v1328_v34 = vld [vmem:[#allocation2 + $0xe8] sm:$0xff] }
 0x1fb   :  { %3357 = vmatprep.subr.mxu0 %v1328_v34 }
 0x1fc   :  { %v4345_v1 = vpop.eup %3726  ;;  %3358 = vmatpush3.msra.mxu0 %v1328_v34 }
 0x1fd   :  { %4896 = vst [vmem:[#allocation24_spill] sm:$0xff] %v4345_v1  ;;  %v4347_v28 = vpop.eup %3728  ;;  %3349 = vmatprep.mubr.msk.f32.mxu1 %vm70_vm0, %v4345_v1  ;;  %3359 = vmatprep.subr.mxu0 %v1327_v50  ;;  %v1326_v1 = vld [vmem:[#allocation2 + $0xd8] sm:$0xff] }
 0x1fe   :  { %4897 = vst [vmem:[#allocation25_spill] sm:$0xff] %v4347_v28  ;;  %3350 = vmatmul.mubr.msk.f32.gmra.mxu1 %vm70_vm0, %v4347_v28  ;;  %3360 = vmatpush3.msra.mxu0 %v1327_v50  ;;  %v1325_v28 = vld [vmem:[#allocation2 + $0xd0] sm:$0xff] }
 0x1ff   :  { %3361 = vmatprep.subr.mxu0 %v1326_v1  ;;  %v4364_v50 = vld [vmem:[#allocation2 + $0xb0] ss:$0 sm:$0xff] }
 0x200   :  { %v4353_v30 = vpop.eup %3730  ;;  %3362 = vmatpush3.msra.mxu0 %v1326_v1 }
 0x201   :  { %4898 = vst [vmem:[#allocation26_spill] sm:$0xff] %v4353_v30  ;;  %v4355_v43 = vpop.eup %3732  ;;  %3352 = vmatprep.mubr.msk.f32.mxu1 %vm70_vm0, %v4353_v30  ;;  %3363 = vmatprep.subr.mxu0 %v1325_v28  ;;  %v1322_v30 = vld [vmem:[#allocation2 + $0xb8] sm:$0xff] }
 0x202   :  { %4899 = vst [vmem:[#allocation27_spill] sm:$0xff] %v4355_v43  ;;  %3353 = vmatmul.mubr.msk.f32.gmra.mxu1 %vm70_vm0, %v4355_v43  ;;  %3364 = vmatpush3.msra.mxu0 %v1325_v28  ;;  %v4361_v43 = vld [vmem:[#allocation2 + $0x118] sm:$0xff] }
 0x203   :  { %3365 = vmatprep.subr.mxu0 %v1324_v58 }
 0x204   :  { %3366 = vmatpush3.msra.mxu0 %v1324_v58 }
 0x205   :  { %3367 = vmatprep.subr.mxu0 %v1323_v53 }
 0x206   :  { %3368 = vmatpush3.msra.mxu0 %v1323_v53 }
 0x207   :  { %3369 = vmatprep.subr.mxu0 %v1322_v30 }
 0x208   :  { %3370 = vmatpush3.msra.mxu0 %v1322_v30 }
 0x209   :  { %3483 = vmatprep.subr.mxu0 %v4361_v43 }
 0x286   :  { %v3309_v34 = vpop.f32.mrf.mxu1 }
 0x287   :  { %v972_v1 = vadd.f32 %v3309_v34, %v4364_v50 }
 0x288   :  { %v966_v39 = vpop.f32.mrf.mxu1 }
 0x289   :  { %3734 = vtanh.f32 %v972_v1  ;;  %v967_v28 = vadd.f32 %v4364_v50, %v966_v39 }
 0x28a   :  { %v3312_v58 = vpop.f32.mrf.mxu1 }
 0x28b   :  { %3736 = vtanh.f32 %v967_v28  ;;  %v982_v53 = vadd.f32 %v3312_v58, %v4364_v50 }
 0x28c   :  { %v976_v7 = vpop.f32.mrf.mxu1 }
 0x28d   :  { %3738 = vtanh.f32 %v982_v53  ;;  %v977_v30 = vadd.f32 %v4364_v50, %v976_v7 }
 0x28e   :  { %v3315_v57 = vpop.f32.mrf.mxu1 }
 0x28f   :  { %3740 = vtanh.f32 %v977_v30  ;;  %v992_v47 = vadd.f32 %v3315_v57, %v4364_v50 }
 0x290   :  { %v986_v36 = vpop.f32.mrf.mxu1 }
 0x291   :  { %3742 = vtanh.f32 %v992_v47  ;;  %v987_v34 = vadd.f32 %v4364_v50, %v986_v36 }
 0x292   :  { %v3318_v12 = vpop.f32.mrf.mxu1 }
 0x293   :  { %3744 = vtanh.f32 %v987_v34  ;;  %v1002_v39 = vadd.f32 %v3318_v12, %v4364_v50  ;;  %v4376_v12 = vld [vmem:[#allocation2 + $0xf8] ss:$0 sm:$0xff] }
 0x294   :  { %v996_v1 = vpop.f32.mrf.mxu1 }
 0x295   :  { %3746 = vtanh.f32 %v1002_v39  ;;  %v997_v28 = vadd.f32 %v4364_v50, %v996_v1 }
 0x296   :  { %v3735_v58 = vpop.eup %3734  ;;  %v3321_v53 = vpop.f32.mrf.mxu1 }
 0x297   :  { %v1158_v62 = vmul.f32 %v3735_v58, %v3735_v58  ;;  %3748 = vtanh.f32 %v997_v28  ;;  %v1012_v7 = vadd.f32 %v3321_v53, %v4364_v50 }
 0x298   :  { %v3737_v30 = vpop.eup %3736  ;;  %v1006_v57 = vpop.f32.mrf.mxu1 }
 0x299   :  { %v1157_v55 = vmul.f32 %v3737_v30, %v3737_v30  ;;  %3750 = vtanh.f32 %v1012_v7  ;;  %v1007_v36 = vadd.f32 %v4364_v50, %v1006_v57  ;;  %v1190_v34 = vsub.f32 1.0, %v1158_v62  ;;  %v1690_v7 = vld [vmem:[#allocation2 + $0x160] sm:$0xff] }
 0x29a   :  { %v3739_v47 = vpop.eup %3738  ;;  %v3324_v49 = vpop.f32.mrf.mxu1  ;;  %3419 = vmatprep.subr.mxu1 %v1690_v7 }
 0x29b   :  { %v1189_v39 = vsub.f32 1.0, %v1157_v55  ;;  %v1160_v40 = vmul.f32 %v3739_v47, %v3739_v47  ;;  %3752 = vtanh.f32 %v1007_v36  ;;  %v1022_v58 = vadd.f32 %v3324_v49, %v4364_v50  ;;  %v426_v49 = vld [vmem:[#allocation2 + $0x110] sm:$0xff]  ;;  %3420 = vmatpush3.msra.mxu1 %v1690_v7 }
 0x29c   :  { %v3741_v1 = vpop.eup %3740  ;;  %v1016_v28 = vpop.f32.mrf.mxu1  ;;  %v1227_v62 = vmul.f32 %v4376_v12, %v1190_v34  ;;  %v1688_v47 = vld [vmem:[#allocation2 + $0x150] sm:$0xff]  ;;  %3421 = vmatprep.subr.mxu1 %v1689_v15 }
 0x29d   :  { %v1226_v53 = vmul.f32 %v4376_v12, %v1189_v39  ;;  %v1159_v33 = vmul.f32 %v3741_v1, %v3741_v1  ;;  %v1017_v30 = vadd.f32 %v4364_v50, %v1016_v28  ;;  %v1192_v6 = vsub.f32 1.0, %v1160_v40  ;;  %3422 = vmatpush3.msra.mxu1 %v1689_v15 }
 0x29e   :  { %v3743_v57 = vpop.eup %3742  ;;  %3754 = vtanh.f32 %v1022_v58  ;;  %v3327_v59 = vpop.f32.mrf.mxu1  ;;  %3423 = vmatprep.subr.mxu1 %v1688_v47 }
 0x29f   :  { %v1191_v55 = vsub.f32 1.0, %v1159_v33  ;;  %v1162_v36 = vmul.f32 %v3743_v57, %v3743_v57  ;;  %3756 = vtanh.f32 %v1017_v30  ;;  %3371 = vmatprep.mubr.msk.f32.mxu0 %vm70_vm0, %v1226_v53  ;;  %v1032_v1 = vadd.f32 %v3327_v59, %v4364_v50  ;;  %v425_v33 = vld [vmem:[#allocation2 + $0x108] sm:$0xff]  ;;  %3424 = vmatpush3.msra.mxu1 %v1688_v47  ;;  %v1685_v47 = vld [vmem:[#allocation2 + $0x138] sm:$0xff] }
 0x2a0   :  { %v3745_v39 = vpop.eup %3744  ;;  %v1026_v28 = vpop.f32.mrf.mxu1  ;;  %3372 = vmatmul.mubr.msk.f32.vlgmr.msra.gmra.mxu0 %vm70_vm0, %v1227_v62  ;;  %v1229_v30 = vmul.f32 %v4376_v12, %v1192_v6 }
 0x2a1   :  { %v1228_v40 = vmul.f32 %v4376_v12, %v1191_v55  ;;  %v1161_v34 = vmul.f32 %v3745_v39, %v3745_v39  ;;  %v1027_v58 = vadd.f32 %v4364_v50, %v1026_v28  ;;  %3484 = vmatpush3.msra.mxu0 %v4361_v43  ;;  %v1194_v7 = vsub.f32 1.0, %v1162_v36  ;;  %v424_v55 = vld [vmem:[#allocation2 + $0x100] sm:$0xff]  ;;  %v1687_v39 = vld [vmem:[#allocation2 + $0x148] sm:$0xff] }
 0x2a2   :  { %v3747_v53 = vpop.eup %3746  ;;  %3758 = vtanh.f32 %v1032_v1  ;;  %v3330_v57 = vpop.f32.mrf.mxu1  ;;  %3485 = vmatprep.subr.mxu0 %v426_v49  ;;  %3425 = vmatprep.subr.mxu1 %v1687_v39 }
 0x2a3   :  { %v1193_v59 = vsub.f32 1.0, %v1161_v34  ;;  %v1164_v62 = vmul.f32 %v3747_v53, %v3747_v53  ;;  %3760 = vtanh.f32 %v1027_v58  ;;  %3374 = vmatprep.mubr.msk.f32.mxu0 %vm70_vm0, %v1228_v40  ;;  %3486 = vmatpush3.msra.mxu0 %v426_v49  ;;  %v1042_v43 = vadd.f32 %v3330_v57, %v4364_v50  ;;  %v1686_v53 = vld [vmem:[#allocation2 + $0x140] sm:$0xff] }
 0x2a4   :  { %v3749_v28 = vpop.eup %3748  ;;  %v1036_v15 = vpop.f32.mrf.mxu1  ;;  %3375 = vmatmul.mubr.msk.f32.gmra.mxu0 %vm70_vm0, %v1229_v30  ;;  %3487 = vmatprep.subr.mxu0 %v425_v33  ;;  %v1231_v40 = vmul.f32 %v4376_v12, %v1194_v7 }
 0x2a5   :  { %v1230_v6 = vmul.f32 %v4376_v12, %v1193_v59  ;;  %v1163_v36 = vmul.f32 %v3749_v28, %v3749_v28  ;;  %v1037_v1 = vadd.f32 %v4364_v50, %v1036_v15  ;;  %3488 = vmatpush3.msra.mxu0 %v425_v33  ;;  %v1196_v49 = vsub.f32 1.0, %v1164_v62  ;;  %3426 = vmatpush3.msra.mxu1 %v1687_v39 }
 0x2a6   :  { %v3751_v34 = vpop.eup %3750  ;;  %3762 = vtanh.f32 %v1042_v43  ;;  %v3333_v58 = vpop.f32.mrf.mxu1  ;;  %3489 = vmatprep.subr.mxu0 %v424_v55  ;;  %3427 = vmatprep.subr.mxu1 %v1686_v53 }
 0x2a7   :  { %v1195_v57 = vsub.f32 1.0, %v1163_v36  ;;  %v1166_v56 = vmul.f32 %v3751_v34, %v3751_v34  ;;  %3764 = vtanh.f32 %v1037_v1  ;;  %3377 = vmatprep.mubr.msk.f32.mxu0 %vm70_vm0, %v1230_v6  ;;  %3490 = vmatpush3.msra.mxu0 %v424_v55  ;;  %v1052_v59 = vadd.f32 %v3333_v58, %v4364_v50  ;;  %v1684_v55 = vld [vmem:[#allocation2 + $0x130] sm:$0xff] }
 0x2a8   :  { %v3753_v30 = vpop.eup %3752  ;;  %v1046_v33 = vpop.f32.mrf.mxu1  ;;  %3378 = vmatmul.mubr.msk.f32.gmra.mxu0 %vm70_vm0, %v1231_v40  ;;  %v1233_v43 = vmul.f32 %v4376_v12, %v1196_v49  ;;  %3428 = vmatpush3.msra.mxu1 %v1686_v53  ;;  %v1683_v49 = vld [vmem:[#allocation2 + $0x128] sm:$0xff] }
 0x2a9   :  { %v1232_v7 = vmul.f32 %v4376_v12, %v1195_v57  ;;  %v1165_v62 = vmul.f32 %v3753_v30, %v3753_v30  ;;  %v1047_v28 = vadd.f32 %v4364_v50, %v1046_v33  ;;  %v1198_v15 = vsub.f32 1.0, %v1166_v56  ;;  %3429 = vmatprep.subr.mxu1 %v1685_v47 }
 0x2aa   :  { %3766 = vtanh.f32 %v1052_v59  ;;  %v3336_v6 = vpop.f32.mrf.mxu1  ;;  %3430 = vmatpush3.msra.mxu1 %v1685_v47 }
 0x2ab   :  { %v3755_v36 = vpop.eup %3754  ;;  %v1197_v1 = vsub.f32 1.0, %v1165_v62  ;;  %3768 = vtanh.f32 %v1047_v28  ;;  %v1062_v34 = vadd.f32 %v3336_v6, %v4364_v50  ;;  %3380 = vmatprep.mubr.msk.f32.mxu0 %vm70_vm0, %v1232_v7  ;;  %3431 = vmatprep.subr.mxu1 %v1684_v55  ;;  %v1235_v30 = vmul.f32 %v4376_v12, %v1198_v15 }
 0x2ac   :  { %v3757_v39 = vpop.eup %3756  ;;  %v1168_v40 = vmul.f32 %v3755_v36, %v3755_v36  ;;  %v1056_v58 = vpop.f32.mrf.mxu1  ;;  %3381 = vmatmul.mubr.msk.f32.gmra.mxu0 %vm70_vm0, %v1233_v43  ;;  %3432 = vmatpush3.msra.mxu1 %v1684_v55 }
 0x2ad   :  { %v1234_v56 = vmul.f32 %v4376_v12, %v1197_v1  ;;  %v1167_v57 = vmul.f32 %v3757_v39, %v3757_v39  ;;  %3770 = vtanh.f32 %v1062_v34  ;;  %v1057_v53 = vadd.f32 %v4364_v50, %v1056_v58  ;;  %3433 = vmatprep.subr.mxu1 %v1683_v49 }
 0x2ae   :  { %v1200_v59 = vsub.f32 1.0, %v1168_v40  ;;  %v3339_v33 = vpop.f32.mrf.mxu1  ;;  %3434 = vmatpush3.msra.mxu1 %v1683_v49 }
 0x2af   :  { %v3759_v7 = vpop.eup %3758  ;;  %v1199_v62 = vsub.f32 1.0, %v1167_v57  ;;  %3772 = vtanh.f32 %v1057_v53  ;;  %v1072_v28 = vadd.f32 %v3339_v33, %v4364_v50  ;;  %3383 = vmatprep.mubr.msk.f32.mxu0 %vm70_vm0, %v1234_v56 }
 0x2b0   :  { %v3761_v47 = vpop.eup %3760  ;;  %v1170_v43 = vmul.f32 %v3759_v7, %v3759_v7  ;;  %v1066_v6 = vpop.f32.mrf.mxu1  ;;  %3384 = vmatmul.mubr.msk.f32.gmra.mxu0 %vm70_vm0, %v1235_v30  ;;  %v1237_v1 = vmul.f32 %v4376_v12, %v1200_v59 }
 0x2b1   :  { %v1236_v36 = vmul.f32 %v4376_v12, %v1199_v62  ;;  %v1169_v15 = vmul.f32 %v3761_v47, %v3761_v47  ;;  %3774 = vtanh.f32 %v1072_v28  ;;  %v1067_v55 = vadd.f32 %v4364_v50, %v1066_v6 }
 0x2b2   :  { %v1202_v34 = vsub.f32 1.0, %v1170_v43  ;;  %v3342_v39 = vpop.f32.mrf.mxu1 }
 0x2b3   :  { %v3763_v40 = vpop.eup %3762  ;;  %v1201_v58 = vsub.f32 1.0, %v1169_v15  ;;  %3776 = vtanh.f32 %v1067_v55  ;;  %v1082_v56 = vadd.f32 %v3342_v39, %v4364_v50  ;;  %3386 = vmatprep.mubr.msk.f32.mxu0 %vm70_vm0, %v1236_v36 }
 0x2b4   :  { %v3765_v57 = vpop.eup %3764  ;;  %v1172_v53 = vmul.f32 %v3763_v40, %v3763_v40  ;;  %v1076_v49 = vpop.f32.mrf.mxu1  ;;  %3387 = vmatmul.mubr.msk.f32.gmra.mxu0 %vm70_vm0, %v1237_v1  ;;  %v1239_v7 = vmul.f32 %v4376_v12, %v1202_v34 }
 0x2b5   :  { %v1238_v30 = vmul.f32 %v4376_v12, %v1201_v58  ;;  %v1171_v33 = vmul.f32 %v3765_v57, %v3765_v57  ;;  %3778 = vtanh.f32 %v1082_v56  ;;  %v1077_v59 = vadd.f32 %v4364_v50, %v1076_v49 }
 0x2b6   :  { %v1204_v62 = vsub.f32 1.0, %v1172_v53  ;;  %v3345_v28 = vpop.f32.mrf.mxu1 }
 0x2b7   :  { %v3767_v47 = vpop.eup %3766  ;;  %v1203_v43 = vsub.f32 1.0, %v1171_v33  ;;  %3780 = vtanh.f32 %v1077_v59  ;;  %v1092_v6 = vadd.f32 %v3345_v28, %v4364_v50  ;;  %3389 = vmatprep.mubr.msk.f32.mxu0 %vm70_vm0, %v1238_v30 }
 0x2b8   :  { %v3769_v36 = vpop.eup %3768  ;;  %v1174_v15 = vmul.f32 %v3767_v47, %v3767_v47  ;;  %v1086_v55 = vpop.f32.mrf.mxu1  ;;  %3390 = vmatmul.mubr.msk.f32.gmra.mxu0 %vm70_vm0, %v1239_v7  ;;  %v1241_v58 = vmul.f32 %v4376_v12, %v1204_v62 }
 0x2b9   :  { %v1240_v1 = vmul.f32 %v4376_v12, %v1203_v43  ;;  %v1173_v39 = vmul.f32 %v3769_v36, %v3769_v36  ;;  %3782 = vtanh.f32 %v1092_v6  ;;  %v1087_v34 = vadd.f32 %v4364_v50, %v1086_v55 }
 0x2ba   :  { %v3771_v40 = vpop.eup %3770  ;;  %v1206_v56 = vsub.f32 1.0, %v1174_v15  ;;  %v3348_v57 = vpop.f32.mrf.mxu1 }
 0x2bb   :  { %v1205_v53 = vsub.f32 1.0, %v1173_v39  ;;  %v1176_v49 = vmul.f32 %v3771_v40, %v3771_v40  ;;  %3784 = vtanh.f32 %v1087_v34  ;;  %v1102_v30 = vadd.f32 %v3348_v57, %v4364_v50  ;;  %3392 = vmatprep.mubr.msk.f32.mxu0 %vm70_vm0, %v1240_v1 }
 0x2bc   :  { %v3773_v33 = vpop.eup %3772  ;;  %v1096_v59 = vpop.f32.mrf.mxu1  ;;  %3393 = vmatmul.mubr.msk.f32.gmra.mxu0 %vm70_vm0, %v1241_v58  ;;  %v1243_v62 = vmul.f32 %v4376_v12, %v1206_v56 }
 0x2bd   :  { %v1242_v7 = vmul.f32 %v4376_v12, %v1205_v53  ;;  %v1175_v28 = vmul.f32 %v3773_v33, %v3773_v33  ;;  %3786 = vtanh.f32 %v1102_v30  ;;  %v1208_v43 = vsub.f32 1.0, %v1176_v49 }
 0x2be   :  { %v3775_v47 = vpop.eup %3774  ;;  %v1097_v6 = vadd.f32 %v4364_v50, %v1096_v59  ;;  %v3351_v36 = vpop.f32.mrf.mxu1 }
 0x2bf   :  { %v1207_v15 = vsub.f32 1.0, %v1175_v28  ;;  %v1178_v55 = vmul.f32 %v3775_v47, %v3775_v47  ;;  %v1112_v39 = vadd.f32 %v3351_v36, %v4364_v50  ;;  %3395 = vmatprep.mubr.msk.f32.mxu0 %vm70_vm0, %v1242_v7  ;;  %v1245_v57 = vmul.f32 %v4376_v12, %v1208_v43 }
 0x2c0   :  { %v3777_v1 = vpop.eup %3776  ;;  %3788 = vtanh.f32 %v1097_v6  ;;  %v1106_v34 = vpop.f32.mrf.mxu1  ;;  %3396 = vmatmul.mubr.msk.f32.gmra.mxu0 %vm70_vm0, %v1243_v62 }
 0x2c1   :  { %v1244_v40 = vmul.f32 %v4376_v12, %v1207_v15  ;;  %v1177_v58 = vmul.f32 %v3777_v1, %v3777_v1  ;;  %3790 = vtanh.f32 %v1112_v39  ;;  %v1210_v53 = vsub.f32 1.0, %v1178_v55 }
 0x2c2   :  { %v3779_v56 = vpop.eup %3778  ;;  %v1107_v49 = vadd.f32 %v4364_v50, %v1106_v34  ;;  %v3354_v30 = vpop.f32.mrf.mxu1 }
 0x2c3   :  { %v1209_v33 = vsub.f32 1.0, %v1177_v58  ;;  %v1180_v59 = vmul.f32 %v3779_v56, %v3779_v56  ;;  %v1122_v7 = vadd.f32 %v3354_v30, %v4364_v50  ;;  %3398 = vmatprep.mubr.msk.f32.mxu0 %vm70_vm0, %v1244_v40  ;;  %v1247_v36 = vmul.f32 %v4376_v12, %v1210_v53 }
 0x2c4   :  { %v3781_v28 = vpop.eup %3780  ;;  %3792 = vtanh.f32 %v1107_v49  ;;  %v1116_v47 = vpop.f32.mrf.mxu1  ;;  %3399 = vmatmul.mubr.msk.f32.gmra.mxu0 %vm70_vm0, %v1245_v57 }
 0x2c5   :  { %v1246_v62 = vmul.f32 %v4376_v12, %v1209_v33  ;;  %v1179_v6 = vmul.f32 %v3781_v28, %v3781_v28  ;;  %3794 = vtanh.f32 %v1122_v7  ;;  %v1212_v15 = vsub.f32 1.0, %v1180_v59 }
 0x2c6   :  { %v3783_v43 = vpop.eup %3782  ;;  %v1117_v55 = vadd.f32 %v4364_v50, %v1116_v47 }
 0x2c7   :  { %v1211_v39 = vsub.f32 1.0, %v1179_v6  ;;  %v1182_v1 = vmul.f32 %v3783_v43, %v3783_v43  ;;  %3401 = vmatprep.mubr.msk.f32.mxu0 %vm70_vm0, %v1246_v62  ;;  %v1249_v57 = vmul.f32 %v4376_v12, %v1212_v15 }
 0x2c8   :  { %v3785_v34 = vpop.eup %3784  ;;  %3796 = vtanh.f32 %v1117_v55  ;;  %3402 = vmatmul.mubr.msk.f32.gmra.mxu0 %vm70_vm0, %v1247_v36 }
 0x2c9   :  { %v1248_v40 = vmul.f32 %v4376_v12, %v1211_v39  ;;  %v1181_v58 = vmul.f32 %v3785_v34, %v3785_v34  ;;  %v1214_v49 = vsub.f32 1.0, %v1182_v1 }
 0x2ca   :  { %v3787_v56 = vpop.eup %3786 }
 0x2cb   :  { %v1213_v30 = vsub.f32 1.0, %v1181_v58  ;;  %v1184_v53 = vmul.f32 %v3787_v56, %v3787_v56  ;;  %3404 = vmatprep.mubr.msk.f32.mxu0 %vm70_vm0, %v1248_v40  ;;  %v1251_v7 = vmul.f32 %v4376_v12, %v1214_v49 }
 0x2cc   :  { %3405 = vmatmul.mubr.msk.f32.gmra.mxu0 %vm70_vm0, %v1249_v57 }
 0x2cd   :  { %v3789_v50 = vpop.eup %3788  ;;  %v1250_v33 = vmul.f32 %v4376_v12, %v1213_v30  ;;  %v1216_v47 = vsub.f32 1.0, %v1184_v53 }
 0x2ce   :  { %v3791_v59 = vpop.eup %3790  ;;  %v1183_v28 = vmul.f32 %v3789_v50, %v3789_v50 }
 0x2cf   :  { %v1186_v62 = vmul.f32 %v3791_v59, %v3791_v59  ;;  %3407 = vmatprep.mubr.msk.f32.mxu0 %vm70_vm0, %v1250_v33  ;;  %v1253_v39 = vmul.f32 %v4376_v12, %v1216_v47 }
 0x2d0   :  { %v1215_v6 = vsub.f32 1.0, %v1183_v28  ;;  %3408 = vmatmul.mubr.msk.f32.gmra.mxu0 %vm70_vm0, %v1251_v7 }
 0x2d1   :  { %v3793_v43 = vpop.eup %3792  ;;  %v1218_v1 = vsub.f32 1.0, %v1186_v62 }
 0x2d2   :  { %v3795_v36 = vpop.eup %3794  ;;  %v1252_v15 = vmul.f32 %v4376_v12, %v1215_v6  ;;  %v1185_v55 = vmul.f32 %v3793_v43, %v3793_v43 }
 0x2d3   :  { %v1188_v34 = vmul.f32 %v3795_v36, %v3795_v36  ;;  %v1255_v49 = vmul.f32 %v4376_v12, %v1218_v1 }
 0x2d4   :  { %v1217_v40 = vsub.f32 1.0, %v1185_v55  ;;  %3410 = vmatprep.mubr.msk.f32.mxu0 %vm70_vm0, %v1252_v15  ;;  %v4903_v15 = vld [vmem:[#allocation8_spill] sm:$0xff] }
 0x2d5   :  { %v3797_v58 = vpop.eup %3796  ;;  %3411 = vmatmul.mubr.msk.f32.gmra.mxu0 %vm70_vm0, %v1253_v39  ;;  %v1220_v30 = vsub.f32 1.0, %v1188_v34  ;;  %v1270_v55 = vmul.f32 %v4903_v15, %v4903_v15  ;;  %v4904_v34 = vld [vmem:[#allocation9_spill] sm:$0xff] }
 0x2d6   :  { %v1254_v56 = vmul.f32 %v4376_v12, %v1217_v40  ;;  %v1187_v57 = vmul.f32 %v3797_v58, %v3797_v58  ;;  %v1271_v40 = vmul.f32 %v4904_v34, %v4904_v34  ;;  %v4916_v15 = vld [vmem:[#allocation21_spill] sm:$0xff] }
 0x2d7   :  { %v1257_v33 = vmul.f32 %v4376_v12, %v1220_v30  ;;  %v4905_v30 = vld [vmem:[#allocation10_spill] sm:$0xff] }
 0x2d8   :  { %v1219_v53 = vsub.f32 1.0, %v1187_v57  ;;  %3413 = vmatprep.mubr.msk.f32.mxu0 %vm70_vm0, %v1254_v56 }
 0x2d9   :  { %3414 = vmatmul.mubr.msk.f32.gmra.mxu0 %vm70_vm0, %v1255_v49  ;;  %v1302_v49 = vsub.f32 1.0, %v1270_v55  ;;  %v1283_v55 = vmul.f32 %v4916_v15, %v4916_v15 }
 0x2da   :  { %v1256_v50 = vmul.f32 %v4376_v12, %v1219_v53  ;;  %v4901_v12 = vld [vmem:[#allocation6_spill] sm:$0xff]  ;;  %v1272_v53 = vmul.f32 %v4905_v30, %v4905_v30 }
 0x2db   :  { %v1268_v59 = vmul.f32 %v4901_v12, %v4901_v12  ;;  %v4914_v12 = vld [vmem:[#allocation19_spill] sm:$0xff] }
 0x2dc   :  { %3416 = vmatprep.mubr.msk.f32.mxu0 %vm70_vm0, %v1256_v50  ;;  %v1303_v50 = vsub.f32 1.0, %v1271_v40 }
 0x2dd   :  { %3417 = vmatmul.mubr.msk.f32.gmra.mxu0 %vm70_vm0, %v1257_v33  ;;  %v1300_v36 = vsub.f32 1.0, %v1268_v59  ;;  %v1281_v59 = vmul.f32 %v4914_v12, %v4914_v12 }
 0x2de   :  { %3491 = vmatprep.mubr.msk.f32.mxu0 %vm437_vm1, %v4046_v63  ;;  %v1258_v63 = vmul.f32 %v4209_v61, %v4209_v61 }
 0x2e1   :  { %3492 = vmatmul.mubr.msk.f32.vlgmr.msra.gmra.mxu0 %vm437_vm1, %v4049_v2  ;;  %v1259_v2 = vmul.f32 %v4212_v3, %v4212_v3 }
 0x2e2   :  { %3494 = vmatprep.mubr.msk.f32.mxu0 %vm437_vm1, %v4056_v5  ;;  %v2309_v5 = vld [vmem:[#allocation2 + $0x180] sm:$0xff] }
 0x2e3   :  { %3539 = vmatprep.subr.mxu1 %v2309_v5 }
 0x2e5   :  { %3495 = vmatmul.mubr.msk.f32.gmra.mxu0 %vm437_vm1, %v4059_v8 }
 0x2e6   :  { %3497 = vmatprep.mubr.msk.f32.mxu0 %vm437_vm1, %v4066_v11  ;;  %v1290_v11 = vsub.f32 1.0, %v1258_v63  ;;  %v4906_v63 = vld [vmem:[#allocation11_spill] sm:$0xff] }
 0x2e9   :  { %3498 = vmatmul.mubr.msk.f32.gmra.mxu0 %vm437_vm1, %v4069_v14  ;;  %v1260_v14 = vmul.f32 %v4219_v10, %v4219_v10  ;;  %v4900_v10 = vld [vmem:[#allocation5_spill] sm:$0xff] }
 0x2ea   :  { %3500 = vmatprep.mubr.msk.f32.mxu0 %vm437_vm1, %v4076_v17  ;;  %v1291_v17 = vsub.f32 1.0, %v1259_v2  ;;  %v1273_v2 = vmul.f32 %v4906_v63, %v4906_v63 }
 0x2ed   :  { %3501 = vmatmul.mubr.msk.f32.gmra.mxu0 %vm437_vm1, %v4079_v20 }
 0x2ee   :  { %3503 = vmatprep.mubr.msk.f32.mxu0 %vm437_vm1, %v4086_v23  ;;  %v1261_v23 = vmul.f32 %v4222_v27, %v4222_v27  ;;  %v1267_v27 = vmul.f32 %v4900_v10, %v4900_v10 }
 0x2f0   :  { %v1299_v7 = vsub.f32 1.0, %v1267_v27 }
 0x2f1   :  { %3504 = vmatmul.mubr.msk.f32.gmra.mxu0 %vm437_vm1, %v4089_v26 }
 0x2f2   :  { %3506 = vmatprep.mubr.msk.f32.mxu0 %vm437_vm1, %v4096_v29 }
 0x2f5   :  { %3507 = vmatmul.mubr.msk.f32.gmra.mxu0 %vm437_vm1, %v4099_v32 }
 0x2f6   :  { %3509 = vmatprep.mubr.msk.f32.mxu0 %vm437_vm1, %v4106_v35  ;;  %v1292_v35 = vsub.f32 1.0, %v1260_v14  ;;  %v1304_v14 = vsub.f32 1.0, %v1272_v53  ;;  %v4918_v53 = vld [vmem:[#allocation23_spill] sm:$0xff] }
 0x2f9   :  { %3510 = vmatmul.mubr.msk.f32.gmra.mxu0 %vm437_vm1, %v4109_v38  ;;  %v1262_v38 = vmul.f32 %v4229_v31, %v4229_v31 }
 0x2fa   :  { %3512 = vmatprep.mubr.msk.f32.mxu0 %vm437_vm1, %v4116_v41  ;;  %v2308_v41 = vld [vmem:[#allocation2 + $0x178] sm:$0xff] }
 0x2fd   :  { %3513 = vmatmul.mubr.msk.f32.gmra.mxu0 %vm437_vm1, %v4119_v46  ;;  %v1293_v46 = vsub.f32 1.0, %v1261_v23  ;;  %v1305_v23 = vsub.f32 1.0, %v1273_v2 }
 0x2fe   :  { %3515 = vmatprep.mubr.msk.f32.mxu0 %vm437_vm1, %v4127_v51 }
 0x301   :  { %3516 = vmatmul.mubr.msk.f32.gmra.mxu0 %vm437_vm1, %v4130_v54  ;;  %v1263_v54 = vmul.f32 %v4232_v37, %v4232_v37 }
 0x302   :  { %3518 = vmatprep.mubr.msk.f32.mxu0 %vm437_vm1, %v4137_v44 }
 0x305   :  { %3519 = vmatmul.mubr.msk.f32.gmra.mxu0 %vm437_vm1, %v4140_v60  ;;  %v2307_v60 = vld [vmem:[#allocation2 + $0x170] sm:$0xff] }
 0x306   :  { %3521 = vmatprep.mubr.msk.f32.mxu0 %vm437_vm1, %v4147_v0 }
 0x309   :  { %3522 = vmatmul.mubr.msk.f32.gmra.mxu0 %vm437_vm1, %v4150_v4 }
 0x30a   :  { %3524 = vmatprep.mubr.msk.f32.mxu0 %vm437_vm1, %v4157_v9  ;;  %v1294_v9 = vsub.f32 1.0, %v1262_v38 }
 0x30d   :  { %3525 = vmatmul.mubr.msk.f32.gmra.mxu0 %vm437_vm1, %v4160_v13  ;;  %v1264_v13 = vmul.f32 %v4239_v42, %v4239_v42 }
 0x30e   :  { %3527 = vmatprep.mubr.msk.f32.mxu0 %vm437_vm1, %v4167_v16  ;;  %v1295_v16 = vsub.f32 1.0, %v1263_v54 }
 0x311   :  { %3528 = vmatmul.mubr.msk.f32.gmra.mxu0 %vm437_vm1, %v4169_v18 }
 0x312   :  { %3530 = vmatprep.mubr.msk.f32.mxu0 %vm437_vm1, %v4175_v19  ;;  %v1265_v19 = vmul.f32 %v4242_v48, %v4242_v48 }
 0x314   :  { %v1297_v61 = vsub.f32 1.0, %v1265_v19  ;;  %v4911_v19 = vld [vmem:[#allocation16_spill] sm:$0xff] }
 0x315   :  { %3531 = vmatmul.mubr.msk.f32.gmra.mxu0 %vm437_vm1, %v4177_v45 }
 0x316   :  { %3533 = vmatprep.mubr.msk.f32.mxu0 %vm437_vm1, %v4183_v21 }
 0x319   :  { %3534 = vmatmul.mubr.msk.f32.gmra.mxu0 %vm437_vm1, %v4185_v22 }
 0x31a   :  { %3536 = vmatprep.mubr.msk.f32.mxu0 %vm437_vm1, %v4191_v24  ;;  %v1296_v24 = vsub.f32 1.0, %v1264_v13 }
 0x31d   :  { %3537 = vmatmul.mubr.msk.f32.gmra.mxu0 %vm437_vm1, %v4193_v25  ;;  %v1266_v25 = vmul.f32 %v4249_v52, %v4249_v52  ;;  %v4902_v52 = vld [vmem:[#allocation7_spill] sm:$0xff] }
 0x31e   :  { %v1269_v47 = vmul.f32 %v4902_v52, %v4902_v52 }
 0x31f   :  { %v1298_v48 = vsub.f32 1.0, %v1266_v25 }
 0x320   :  { %v1301_v39 = vsub.f32 1.0, %v1269_v47 }
 0x360   :  { %v3373_v8 = vpop.f32.mrf.mxu0 }
 0x361   :  { %v1652_v29 = vmul.f32 %v3373_v8, %v1291_v17  ;;  %v4907_v17 = vld [vmem:[#allocation12_spill] sm:$0xff] }
 0x362   :  { %v1492_v20 = vpop.f32.mrf.mxu0 }
 0x363   :  { %v1651_v26 = vmul.f32 %v1492_v20, %v1290_v11  ;;  %v1274_v20 = vmul.f32 %v4907_v17, %v4907_v17  ;;  %v4920_v17 = vld [vmem:[#allocation25_spill] sm:$0xff] }
 0x364   :  { %v3376_v32 = vpop.f32.mrf.mxu0 }
 0x365   :  { %3435 = vmatprep.mubr.msk.f32.mxu1 %vm70_vm0, %v1651_v26  ;;  %v1654_v0 = vmul.f32 %v3376_v32, %v1293_v46  ;;  %v1306_v46 = vsub.f32 1.0, %v1274_v20  ;;  %v1287_v20 = vmul.f32 %v4920_v17, %v4920_v17 }
 0x366   :  { %v1502_v51 = vpop.f32.mrf.mxu0  ;;  %3436 = vmatmul.mubr.msk.f32.vlgmr.msra.gmra.mxu1 %vm70_vm0, %v1652_v29  ;;  %v4908_v29 = vld [vmem:[#allocation13_spill] sm:$0xff] }
 0x367   :  { %v1653_v44 = vmul.f32 %v1502_v51, %v1292_v35  ;;  %3540 = vmatpush3.msra.mxu1 %v2309_v5  ;;  %v1275_v32 = vmul.f32 %v4908_v29, %v4908_v29  ;;  %v4909_v51 = vld [vmem:[#allocation14_spill] sm:$0xff] }
 0x368   :  { %v3379_v4 = vpop.f32.mrf.mxu0  ;;  %3541 = vmatprep.subr.mxu1 %v2308_v41  ;;  %v1276_v54 = vmul.f32 %v4909_v51, %v4909_v51  ;;  %v4922_v51 = vld [vmem:[#allocation27_spill] sm:$0xff] }
 0x369   :  { %3438 = vmatprep.mubr.msk.f32.mxu1 %vm70_vm0, %v1653_v44  ;;  %3542 = vmatpush3.msra.mxu1 %v2308_v41  ;;  %v1656_v21 = vmul.f32 %v3379_v4, %v1295_v16  ;;  %v1307_v44 = vsub.f32 1.0, %v1275_v32 }
 0x36a   :  { %v1512_v18 = vpop.f32.mrf.mxu0  ;;  %3439 = vmatmul.mubr.msk.f32.gmra.mxu1 %vm70_vm0, %v1654_v0  ;;  %3543 = vmatprep.subr.mxu1 %v2307_v60  ;;  %v4910_v0 = vld [vmem:[#allocation15_spill] sm:$0xff] }
 0x36b   :  { %v1655_v45 = vmul.f32 %v1512_v18, %v1294_v9  ;;  %3544 = vmatpush3.msra.mxu1 %v2307_v60  ;;  %v1277_v4 = vmul.f32 %v4910_v0, %v4910_v0  ;;  %v1308_v18 = vsub.f32 1.0, %v1276_v54  ;;  %v1289_v54 = vmul.f32 %v4922_v51, %v4922_v51 }
 0x36c   :  { %v3382_v22 = vpop.f32.mrf.mxu0 }
 0x36d   :  { %3441 = vmatprep.mubr.msk.f32.mxu1 %vm70_vm0, %v1655_v45  ;;  %v1658_v37 = vmul.f32 %v3382_v22, %v1297_v61  ;;  %v1278_v45 = vmul.f32 %v4911_v19, %v4911_v19  ;;  %v2306_v19 = vld [vmem:[#allocation2 + $0x168] sm:$0xff] }
 0x36e   :  { %v1522_v3 = vpop.f32.mrf.mxu0  ;;  %3442 = vmatmul.mubr.msk.f32.gmra.mxu1 %vm70_vm0, %v1656_v21  ;;  %v1309_v21 = vsub.f32 1.0, %v1277_v4  ;;  %3545 = vmatprep.subr.mxu1 %v2306_v19 }
 0x36f   :  { %v1657_v31 = vmul.f32 %v1522_v3, %v1296_v24  ;;  %v4912_v24 = vld [vmem:[#allocation17_spill] sm:$0xff]  ;;  %v1310_v27 = vsub.f32 1.0, %v1278_v45  ;;  %3546 = vmatpush3.msra.mxu1 %v2306_v19 }
 0x370   :  { %v3385_v42 = vpop.f32.mrf.mxu0  ;;  %v1279_v25 = vmul.f32 %v4912_v24, %v4912_v24 }
 0x371   :  { %3444 = vmatprep.mubr.msk.f32.mxu1 %vm70_vm0, %v1657_v31  ;;  %v1660_v6 = vmul.f32 %v3385_v42, %v1299_v7  ;;  %v4913_v31 = vld [vmem:[#allocation18_spill] sm:$0xff] }
 0x372   :  { %v1532_v28 = vpop.f32.mrf.mxu0  ;;  %3445 = vmatmul.mubr.msk.f32.gmra.mxu1 %vm70_vm0, %v1658_v37  ;;  %v1280_v37 = vmul.f32 %v4913_v31, %v4913_v31  ;;  %v1311_v42 = vsub.f32 1.0, %v1279_v25 }
 0x373   :  { %v1659_v62 = vmul.f32 %v1532_v28, %v1298_v48 }
 0x374   :  { %v3388_v43 = vpop.f32.mrf.mxu0  ;;  %v1312_v47 = vsub.f32 1.0, %v1280_v37 }
 0x375   :  { %3447 = vmatprep.mubr.msk.f32.mxu1 %vm70_vm0, %v1659_v62  ;;  %v1662_v56 = vmul.f32 %v3388_v43, %v1301_v39  ;;  %v4915_v62 = vld [vmem:[#allocation20_spill] sm:$0xff]  ;;  %v1313_v43 = vsub.f32 1.0, %v1281_v59 }
 0x376   :  { %v1542_v1 = vpop.f32.mrf.mxu0  ;;  %3448 = vmatmul.mubr.msk.f32.gmra.mxu1 %vm70_vm0, %v1660_v6  ;;  %v1282_v6 = vmul.f32 %v4915_v62, %v4915_v62 }
 0x377   :  { %v1661_v58 = vmul.f32 %v1542_v1, %v1300_v36 }
 0x378   :  { %v3391_v57 = vpop.f32.mrf.mxu0  ;;  %v1314_v40 = vsub.f32 1.0, %v1282_v6 }
 0x379   :  { %3450 = vmatprep.mubr.msk.f32.mxu1 %vm70_vm0, %v1661_v58  ;;  %v1664_v8 = vmul.f32 %v3391_v57, %v1303_v50  ;;  %v1315_v58 = vsub.f32 1.0, %v1283_v55  ;;  %v4917_v57 = vld [vmem:[#allocation22_spill] sm:$0xff]  ;;  %v1285_v50 = vmul.f32 %v4918_v53, %v4918_v53 }
 0x37a   :  { %v1552_v33 = vpop.f32.mrf.mxu0  ;;  %3451 = vmatmul.mubr.msk.f32.gmra.mxu1 %vm70_vm0, %v1662_v56 }
 0x37b   :  { %v1663_v5 = vmul.f32 %v1552_v33, %v1302_v49  ;;  %v1284_v49 = vmul.f32 %v4917_v57, %v4917_v57 }
 0x37c   :  { %v3394_v11 = vpop.f32.mrf.mxu0 }
 0x37d   :  { %3453 = vmatprep.mubr.msk.f32.mxu1 %vm70_vm0, %v1663_v5  ;;  %v1666_v38 = vmul.f32 %v3394_v11, %v1305_v23  ;;  %v1316_v2 = vsub.f32 1.0, %v1284_v49  ;;  %v4919_v5 = vld [vmem:[#allocation24_spill] sm:$0xff]  ;;  %v1317_v11 = vsub.f32 1.0, %v1285_v50 }
 0x37e   :  { %v1562_v26 = vpop.f32.mrf.mxu0  ;;  %3454 = vmatmul.mubr.msk.f32.gmra.mxu1 %vm70_vm0, %v1664_v8  ;;  %v1286_v8 = vmul.f32 %v4919_v5, %v4919_v5 }
 0x37f   :  { %v1665_v35 = vmul.f32 %v1562_v26, %v1304_v14 }
 0x380   :  { %v3397_v41 = vpop.f32.mrf.mxu0  ;;  %v1318_v32 = vsub.f32 1.0, %v1286_v8 }
 0x381   :  { %3456 = vmatprep.mubr.msk.f32.mxu1 %vm70_vm0, %v1665_v35  ;;  %v1668_v13 = vmul.f32 %v3397_v41, %v1307_v44  ;;  %v4921_v35 = vld [vmem:[#allocation26_spill] sm:$0xff]  ;;  %v1319_v41 = vsub.f32 1.0, %v1287_v20 }
 0x382   :  { %v1572_v60 = vpop.f32.mrf.mxu0  ;;  %3457 = vmatmul.mubr.msk.f32.gmra.mxu1 %vm70_vm0, %v1666_v38  ;;  %v1288_v38 = vmul.f32 %v4921_v35, %v4921_v35 }
 0x383   :  { %v1667_v9 = vmul.f32 %v1572_v60, %v1306_v46 }
 0x384   :  { %v3400_v16 = vpop.f32.mrf.mxu0  ;;  %v1320_v4 = vsub.f32 1.0, %v1288_v38 }
 0x385   :  { %3459 = vmatprep.mubr.msk.f32.mxu1 %vm70_vm0, %v1667_v9  ;;  %v1670_v3 = vmul.f32 %v3400_v16, %v1309_v21  ;;  %v1321_v9 = vsub.f32 1.0, %v1289_v54 }
 0x386   :  { %v1582_v22 = vpop.f32.mrf.mxu0  ;;  %3460 = vmatmul.mubr.msk.f32.gmra.mxu1 %vm70_vm0, %v1668_v13 }
 0x387   :  { %v1669_v61 = vmul.f32 %v1582_v22, %v1308_v18 }
 0x388   :  { %v3403_v10 = vpop.f32.mrf.mxu0 }
 0x389   :  { %3462 = vmatprep.mubr.msk.f32.mxu1 %vm70_vm0, %v1669_v61  ;;  %v1672_v28 = vmul.f32 %v3403_v10, %v1311_v42 }
 0x38a   :  { %v1592_v48 = vpop.f32.mrf.mxu0  ;;  %3463 = vmatmul.mubr.msk.f32.gmra.mxu1 %vm70_vm0, %v1670_v3 }
 0x38b   :  { %v1671_v7 = vmul.f32 %v1592_v48, %v1310_v27 }
 0x38c   :  { %v3406_v52 = vpop.f32.mrf.mxu0 }
 0x38d   :  { %3465 = vmatprep.mubr.msk.f32.mxu1 %vm70_vm0, %v1671_v7  ;;  %v1674_v1 = vmul.f32 %v3406_v52, %v1313_v43 }
 0x38e   :  { %v1602_v36 = vpop.f32.mrf.mxu0  ;;  %3466 = vmatmul.mubr.msk.f32.gmra.mxu1 %vm70_vm0, %v1672_v28 }
 0x38f   :  { %v1673_v39 = vmul.f32 %v1602_v36, %v1312_v47  ;;  %v4633_v47 = vld [vmem:[#allocation2 + $0x120] ss:$0 sm:$0xff] }
 0x390   :  { %v3409_v34 = vpop.f32.mrf.mxu0 }
 0x391   :  { %3468 = vmatprep.mubr.msk.f32.mxu1 %vm70_vm0, %v1673_v39  ;;  %v1676_v33 = vmul.f32 %v3409_v34, %v1315_v58 }
 0x392   :  { %v1612_v56 = vpop.f32.mrf.mxu0  ;;  %3469 = vmatmul.mubr.msk.f32.gmra.mxu1 %vm70_vm0, %v1674_v1 }
 0x393   :  { %v1675_v30 = vmul.f32 %v1612_v56, %v1314_v40 }
 0x395   :  { %v3412_v63 = vpop.f32.mrf.mxu0  ;;  %3471 = vmatprep.mubr.msk.f32.mxu1 %vm70_vm0, %v1675_v30 }
 0x396   :  { %3472 = vmatmul.mubr.msk.f32.gmra.mxu1 %vm70_vm0, %v1676_v33  ;;  %v1678_v26 = vmul.f32 %v3412_v63, %v1317_v11 }
 0x397   :  { %v1622_v14 = vpop.f32.mrf.mxu0 }
 0x398   :  { %v1677_v23 = vmul.f32 %v1622_v14, %v1316_v2 }
 0x399   :  { %v3415_v29 = vpop.f32.mrf.mxu0 }
 0x39a   :  { %3474 = vmatprep.mubr.msk.f32.mxu1 %vm70_vm0, %v1677_v23  ;;  %v1680_v60 = vmul.f32 %v3415_v29, %v1319_v41 }
 0x39b   :  { %v1632_v46 = vpop.f32.mrf.mxu0  ;;  %3475 = vmatmul.mubr.msk.f32.gmra.mxu1 %vm70_vm0, %v1678_v26 }
 0x39c   :  { %v1679_v44 = vmul.f32 %v1632_v46, %v1318_v32 }
 0x39d   :  { %v3418_v0 = vpop.f32.mrf.mxu0 }
 0x39e   :  { %3477 = vmatprep.mubr.msk.f32.mxu1 %vm70_vm0, %v1679_v44  ;;  %v1682_v18 = vmul.f32 %v3418_v0, %v1321_v9 }
 0x39f   :  { %v1642_v13 = vpop.f32.mrf.mxu0  ;;  %3478 = vmatmul.mubr.msk.f32.gmra.mxu1 %vm70_vm0, %v1680_v60 }
 0x3a0   :  { %v1681_v16 = vmul.f32 %v1642_v13, %v1320_v4 }
 0x3a1   :  { %v3493_v45 = vpop.f32.mrf.mxu0 }
 0x3a2   :  { %3480 = vmatprep.mubr.msk.f32.mxu1 %vm70_vm0, %v1681_v16 }
 0x3a3   :  { %3481 = vmatmul.mubr.msk.f32.gmra.mxu1 %vm70_vm0, %v1682_v18  ;;  %v2078_v21 = vpop.f32.mrf.mxu0 }
 0x3a5   :  { %v3496_v22 = vpop.f32.mrf.mxu0 }
 0x3a7   :  { %v2088_v24 = vpop.f32.mrf.mxu0 }
 0x3a9   :  { %v3499_v25 = vpop.f32.mrf.mxu0 }
 0x3ab   :  { %v2098_v61 = vpop.f32.mrf.mxu0 }
 0x3ad   :  { %v3502_v3 = vpop.f32.mrf.mxu0 }
 0x3af   :  { %v2108_v10 = vpop.f32.mrf.mxu0 }
 0x3b1   :  { %v3505_v27 = vpop.f32.mrf.mxu0 }
 0x3b3   :  { %v2118_v31 = vpop.f32.mrf.mxu0 }
 0x3b5   :  { %v3508_v37 = vpop.f32.mrf.mxu0 }
 0x3b7   :  { %v2128_v42 = vpop.f32.mrf.mxu0 }
 0x3b9   :  { %v4625_v48 = vpop.f32.mrf.mxu0 }
 0x3bb   :  { %v4627_v12 = vpop.f32.mrf.mxu0 }
 0x3bd   :  { %v4629_v59 = vpop.f32.mrf.mxu0 }
 0x3bf   :  { %v4631_v7 = vpop.f32.mrf.mxu0 }
 0x3c1   :  { %v4635_v6 = vpop.f32.mrf.mxu0 }
 0x3c3   :  { %v4639_v34 = vpop.f32.mrf.mxu0 }
 0x3c5   :  { %v4643_v53 = vpop.f32.mrf.mxu0 }
 0x3c7   :  { %v4647_v11 = vpop.f32.mrf.mxu0 }
 0x3c9   :  { %v4651_v32 = vpop.f32.mrf.mxu0 }
 0x3cb   :  { %v4657_v0 = vpop.f32.mrf.mxu0 }
 0x426   :  { %v3437_v28 = vpop.f32.mrf.mxu1 }
 0x427   :  { %v2084_v52 = vadd.f32 %v3493_v45, %v3437_v28 }
 0x428   :  { %v1853_v62 = vpop.f32.mrf.mxu1 }
 0x429   :  { %v2079_v43 = vadd.f32 %v2078_v21, %v1853_v62  ;;  %v2243_v36 = vadd.f32 %v4633_v47, %v2084_v52 }
 0x42a   :  { %v3440_v15 = vpop.f32.mrf.mxu1 }
 0x42b   :  { %v2242_v55 = vadd.f32 %v4633_v47, %v2079_v43  ;;  %v2094_v39 = vadd.f32 %v3496_v22, %v3440_v15  ;;  %v3526_v22 = vpop.f32.mrf.mxu0 }
 0x42c   :  { %v1863_v1 = vpop.f32.mrf.mxu1 }
 0x42d   :  { %3798 = vtanh.f32 %v2242_v55  ;;  %v2089_v40 = vadd.f32 %v2088_v24, %v1863_v1  ;;  %v2245_v58 = vadd.f32 %v4633_v47, %v2094_v39 }
 0x42e   :  { %3800 = vtanh.f32 %v2243_v36  ;;  %v3443_v56 = vpop.f32.mrf.mxu1 }
 0x42f   :  { %v2244_v57 = vadd.f32 %v4633_v47, %v2089_v40  ;;  %v2104_v49 = vadd.f32 %v3499_v25, %v3443_v56 }
 0x430   :  { %v1873_v30 = vpop.f32.mrf.mxu1 }
 0x431   :  { %3802 = vtanh.f32 %v2244_v57  ;;  %v2099_v50 = vadd.f32 %v2098_v61, %v1873_v30  ;;  %v2247_v33 = vadd.f32 %v4633_v47, %v2104_v49 }
 0x432   :  { %3804 = vtanh.f32 %v2245_v58  ;;  %v3446_v63 = vpop.f32.mrf.mxu1 }
 0x433   :  { %v2246_v2 = vadd.f32 %v4633_v47, %v2099_v50  ;;  %v2114_v5 = vadd.f32 %v3502_v3, %v3446_v63 }
 0x434   :  { %v1883_v8 = vpop.f32.mrf.mxu1 }
 0x435   :  { %3806 = vtanh.f32 %v2246_v2  ;;  %v2109_v14 = vadd.f32 %v2108_v10, %v1883_v8  ;;  %v2249_v17 = vadd.f32 %v4633_v47, %v2114_v5 }
 0x436   :  { %3808 = vtanh.f32 %v2247_v33  ;;  %v3449_v20 = vpop.f32.mrf.mxu1 }
 0x437   :  { %v2248_v23 = vadd.f32 %v4633_v47, %v2109_v14  ;;  %v2124_v26 = vadd.f32 %v3505_v27, %v3449_v20 }
 0x438   :  { %v1893_v29 = vpop.f32.mrf.mxu1 }
 0x439   :  { %3810 = vtanh.f32 %v2248_v23  ;;  %v2119_v35 = vadd.f32 %v2118_v31, %v1893_v29  ;;  %v2251_v41 = vadd.f32 %v4633_v47, %v2124_v26 }
 0x43a   :  { %v3799_v38 = vpop.eup %3798  ;;  %3812 = vtanh.f32 %v2249_v17  ;;  %v3452_v46 = vpop.f32.mrf.mxu1 }
 0x43b   :  { %v3801_v51 = vpop.eup %3800  ;;  %v2250_v54 = vadd.f32 %v4633_v47, %v2119_v35  ;;  %v2134_v44 = vadd.f32 %v3508_v37, %v3452_v46  ;;  %3547 = vmatprep.mubr.msk.f32.mxu1 %vm437_vm1, %v3799_v38 }
 0x43c   :  { %v1903_v60 = vpop.f32.mrf.mxu1  ;;  %3548 = vmatmul.mubr.msk.f32.vlgmr.msra.gmra.mxu1 %vm437_vm1, %v3801_v51 }
 0x43d   :  { %3814 = vtanh.f32 %v2250_v54  ;;  %v2129_v4 = vadd.f32 %v2128_v42, %v1903_v60  ;;  %v2253_v13 = vadd.f32 %v4633_v47, %v2134_v44  ;;  %v2188_v42 = vpop.f32.mrf.mxu0 }
 0x43e   :  { %v3803_v9 = vpop.eup %3802  ;;  %3816 = vtanh.f32 %v2251_v41  ;;  %v3455_v16 = vpop.f32.mrf.mxu1 }
 0x43f   :  { %v3805_v18 = vpop.eup %3804  ;;  %v2252_v19 = vadd.f32 %v4633_v47, %v2129_v4  ;;  %v2144_v45 = vadd.f32 %v4625_v48, %v3455_v16  ;;  %3550 = vmatprep.mubr.msk.f32.mxu1 %vm437_vm1, %v3803_v9  ;;  %v3529_v15 = vpop.f32.mrf.mxu0 }
 0x440   :  { %v1913_v21 = vpop.f32.mrf.mxu1  ;;  %3551 = vmatmul.mubr.msk.f32.gmra.mxu1 %vm437_vm1, %v3805_v18 }
 0x441   :  { %3818 = vtanh.f32 %v2252_v19  ;;  %v2139_v24 = vadd.f32 %v4627_v12, %v1913_v21  ;;  %v2255_v61 = vadd.f32 %v4633_v47, %v2144_v45  ;;  %v2198_v57 = vpop.f32.mrf.mxu0 }
 0x442   :  { %v3807_v25 = vpop.eup %3806  ;;  %3820 = vtanh.f32 %v2253_v13  ;;  %v3458_v3 = vpop.f32.mrf.mxu1 }
 0x443   :  { %v3809_v10 = vpop.eup %3808  ;;  %v2254_v27 = vadd.f32 %v4633_v47, %v2139_v24  ;;  %v2154_v31 = vadd.f32 %v4629_v59, %v3458_v3  ;;  %3553 = vmatprep.mubr.msk.f32.mxu1 %vm437_vm1, %v3807_v25  ;;  %v3532_v5 = vpop.f32.mrf.mxu0 }
 0x444   :  { %v1923_v37 = vpop.f32.mrf.mxu1  ;;  %3554 = vmatmul.mubr.msk.f32.gmra.mxu1 %vm437_vm1, %v3809_v10 }
 0x445   :  { %3822 = vtanh.f32 %v2254_v27  ;;  %v2149_v48 = vadd.f32 %v4631_v7, %v1923_v37  ;;  %v2257_v28 = vadd.f32 %v4633_v47, %v2154_v31 }
 0x446   :  { %v3811_v12 = vpop.eup %3810  ;;  %3824 = vtanh.f32 %v2255_v61  ;;  %v3461_v52 = vpop.f32.mrf.mxu1 }
 0x447   :  { %v3813_v62 = vpop.eup %3812  ;;  %v2256_v43 = vadd.f32 %v4633_v47, %v2149_v48  ;;  %v2164_v36 = vadd.f32 %v4635_v6, %v3461_v52  ;;  %3556 = vmatprep.mubr.msk.f32.mxu1 %vm437_vm1, %v3811_v12 }
 0x448   :  { %v1933_v59 = vpop.f32.mrf.mxu1  ;;  %3557 = vmatmul.mubr.msk.f32.gmra.mxu1 %vm437_vm1, %v3813_v62 }
 0x449   :  { %3826 = vtanh.f32 %v2256_v43  ;;  %v2159_v55 = vadd.f32 %v4639_v34, %v1933_v59  ;;  %v2259_v39 = vadd.f32 %v4633_v47, %v2164_v36 }
 0x44a   :  { %v3815_v7 = vpop.eup %3814  ;;  %3828 = vtanh.f32 %v2257_v28  ;;  %v3464_v1 = vpop.f32.mrf.mxu1 }
 0x44b   :  { %v3817_v40 = vpop.eup %3816  ;;  %v2258_v58 = vadd.f32 %v4633_v47, %v2159_v55  ;;  %v2174_v56 = vadd.f32 %v4643_v53, %v3464_v1  ;;  %3559 = vmatprep.mubr.msk.f32.mxu1 %vm437_vm1, %v3815_v7 }
 0x44c   :  { %v1943_v6 = vpop.f32.mrf.mxu1  ;;  %3560 = vmatmul.mubr.msk.f32.gmra.mxu1 %vm437_vm1, %v3817_v40 }
 0x44d   :  { %3830 = vtanh.f32 %v2258_v58  ;;  %v2169_v49 = vadd.f32 %v4647_v11, %v1943_v6  ;;  %v2261_v30 = vadd.f32 %v4633_v47, %v2174_v56 }
 0x44e   :  { %v3819_v34 = vpop.eup %3818  ;;  %3832 = vtanh.f32 %v2259_v39  ;;  %v3467_v50 = vpop.f32.mrf.mxu1 }
 0x44f   :  { %v3821_v33 = vpop.eup %3820  ;;  %v2260_v63 = vadd.f32 %v4633_v47, %v2169_v49  ;;  %v2184_v2 = vadd.f32 %v4651_v32, %v3467_v50  ;;  %3562 = vmatprep.mubr.msk.f32.mxu1 %vm437_vm1, %v3819_v34  ;;  %v2208_v32 = vpop.f32.mrf.mxu0  ;;  %v4721_v50 = vld [vmem:[#allocation2 + $0x188] ss:$0 sm:$0xff] }
 0x450   :  { %v1953_v53 = vpop.f32.mrf.mxu1  ;;  %3563 = vmatmul.mubr.msk.f32.gmra.mxu1 %vm437_vm1, %v3821_v33 }
 0x451   :  { %3834 = vtanh.f32 %v2260_v63  ;;  %v2179_v8 = vadd.f32 %v4657_v0, %v1953_v53  ;;  %v2263_v14 = vadd.f32 %v4633_v47, %v2184_v2  ;;  %v3535_v0 = vpop.f32.mrf.mxu0 }
 0x452   :  { %v3823_v11 = vpop.eup %3822  ;;  %3836 = vtanh.f32 %v2261_v30  ;;  %v3470_v17 = vpop.f32.mrf.mxu1 }
 0x453   :  { %v3825_v20 = vpop.eup %3824  ;;  %v2262_v23 = vadd.f32 %v4633_v47, %v2179_v8  ;;  %v2194_v26 = vadd.f32 %v3526_v22, %v3470_v17  ;;  %3565 = vmatprep.mubr.msk.f32.mxu1 %vm437_vm1, %v3823_v11  ;;  %v2218_v21 = vpop.f32.mrf.mxu0 }
 0x454   :  { %v1963_v29 = vpop.f32.mrf.mxu1  ;;  %3566 = vmatmul.mubr.msk.f32.gmra.mxu1 %vm437_vm1, %v3825_v20 }
 0x455   :  { %3838 = vtanh.f32 %v2262_v23  ;;  %v2189_v35 = vadd.f32 %v2188_v42, %v1963_v29  ;;  %v2265_v41 = vadd.f32 %v4633_v47, %v2194_v26  ;;  %v3538_v37 = vpop.f32.mrf.mxu0 }
 0x456   :  { %v3827_v38 = vpop.eup %3826  ;;  %3840 = vtanh.f32 %v2263_v14  ;;  %v3473_v46 = vpop.f32.mrf.mxu1 }
 0x457   :  { %v3829_v51 = vpop.eup %3828  ;;  %v2264_v54 = vadd.f32 %v4633_v47, %v2189_v35  ;;  %v2204_v44 = vadd.f32 %v3529_v15, %v3473_v46  ;;  %3568 = vmatprep.mubr.msk.f32.mxu1 %vm437_vm1, %v3827_v38  ;;  %v2228_v59 = vpop.f32.mrf.mxu0 }
 0x458   :  { %v1973_v60 = vpop.f32.mrf.mxu1  ;;  %3569 = vmatmul.mubr.msk.f32.gmra.mxu1 %vm437_vm1, %v3829_v51 }
 0x459   :  { %3842 = vtanh.f32 %v2264_v54  ;;  %v2199_v4 = vadd.f32 %v2198_v57, %v1973_v60  ;;  %v2267_v13 = vadd.f32 %v4633_v47, %v2204_v44 }
 0x45a   :  { %v3831_v9 = vpop.eup %3830  ;;  %3844 = vtanh.f32 %v2265_v41 }
 0x45b   :  { %v3833_v16 = vpop.eup %3832  ;;  %v2266_v18 = vadd.f32 %v4633_v47, %v2199_v4  ;;  %v3476_v19 = vpop.f32.mrf.mxu1  ;;  %3571 = vmatprep.mubr.msk.f32.mxu1 %vm437_vm1, %v3831_v9 }
 0x45c   :  { %v2214_v45 = vadd.f32 %v3532_v5, %v3476_v19  ;;  %3572 = vmatmul.mubr.msk.f32.gmra.mxu1 %vm437_vm1, %v3833_v16 }
 0x45d   :  { %3846 = vtanh.f32 %v2266_v18  ;;  %v1983_v22 = vpop.f32.mrf.mxu1 }
 0x45e   :  { %v3835_v24 = vpop.eup %3834  ;;  %3848 = vtanh.f32 %v2267_v13  ;;  %v2209_v25 = vadd.f32 %v2208_v32, %v1983_v22  ;;  %v2269_v3 = vadd.f32 %v4633_v47, %v2214_v45 }
 0x45f   :  { %v3837_v61 = vpop.eup %3836  ;;  %v3479_v10 = vpop.f32.mrf.mxu1  ;;  %3574 = vmatprep.mubr.msk.f32.mxu1 %vm437_vm1, %v3835_v24 }
 0x460   :  { %v2268_v27 = vadd.f32 %v4633_v47, %v2209_v25  ;;  %v2224_v31 = vadd.f32 %v3535_v0, %v3479_v10  ;;  %3575 = vmatmul.mubr.msk.f32.gmra.mxu1 %vm437_vm1, %v3837_v61 }
 0x461   :  { %v1993_v42 = vpop.f32.mrf.mxu1 }
 0x462   :  { %v3839_v48 = vpop.eup %3838  ;;  %3850 = vtanh.f32 %v2268_v27  ;;  %v2219_v12 = vadd.f32 %v2218_v21, %v1993_v42  ;;  %v2271_v52 = vadd.f32 %v4633_v47, %v2224_v31 }
 0x463   :  { %v3841_v28 = vpop.eup %3840  ;;  %3852 = vtanh.f32 %v2269_v3  ;;  %v3482_v62 = vpop.f32.mrf.mxu1  ;;  %3577 = vmatprep.mubr.msk.f32.mxu1 %vm437_vm1, %v3839_v48 }
 0x464   :  { %v2270_v43 = vadd.f32 %v4633_v47, %v2219_v12  ;;  %v2234_v36 = vadd.f32 %v3538_v37, %v3482_v62  ;;  %3578 = vmatmul.mubr.msk.f32.gmra.mxu1 %vm437_vm1, %v3841_v28 }
 0x465   :  { %v2003_v15 = vpop.f32.mrf.mxu1 }
 0x466   :  { %v3843_v55 = vpop.eup %3842  ;;  %3854 = vtanh.f32 %v2270_v43  ;;  %v2229_v7 = vadd.f32 %v2228_v59, %v2003_v15  ;;  %v2273_v1 = vadd.f32 %v4633_v47, %v2234_v36 }
 0x467   :  { %v3845_v39 = vpop.eup %3844  ;;  %3856 = vtanh.f32 %v2271_v52  ;;  %3580 = vmatprep.mubr.msk.f32.mxu1 %vm437_vm1, %v3843_v55 }
 0x468   :  { %v2272_v40 = vadd.f32 %v4633_v47, %v2229_v7  ;;  %3581 = vmatmul.mubr.msk.f32.gmra.mxu1 %vm437_vm1, %v3845_v39 }
 0x46a   :  { %v3847_v58 = vpop.eup %3846  ;;  %3858 = vtanh.f32 %v2272_v40 }
 0x46b   :  { %v3849_v56 = vpop.eup %3848  ;;  %3860 = vtanh.f32 %v2273_v1  ;;  %3583 = vmatprep.mubr.msk.f32.mxu1 %vm437_vm1, %v3847_v58 }
 0x46c   :  { %3584 = vmatmul.mubr.msk.f32.gmra.mxu1 %vm437_vm1, %v3849_v56 }
 0x46f   :  { %v3851_v6 = vpop.eup %3850 }
 0x470   :  { %v3853_v57 = vpop.eup %3852  ;;  %3586 = vmatprep.mubr.msk.f32.mxu1 %vm437_vm1, %v3851_v6 }
 0x471   :  { %3587 = vmatmul.mubr.msk.f32.gmra.mxu1 %vm437_vm1, %v3853_v57 }
 0x473   :  { %v3855_v49 = vpop.eup %3854 }
 0x474   :  { %v3857_v34 = vpop.eup %3856  ;;  %3589 = vmatprep.mubr.msk.f32.mxu1 %vm437_vm1, %v3855_v49 }
 0x475   :  { %3590 = vmatmul.mubr.msk.f32.gmra.mxu1 %vm437_vm1, %v3857_v34 }
 0x477   :  { %v3859_v47 = vpop.eup %3858 }
 0x478   :  { %v3861_v30 = vpop.eup %3860  ;;  %3592 = vmatprep.mubr.msk.f32.mxu1 %vm437_vm1, %v3859_v47 }
 0x479   :  { %3593 = vmatmul.mubr.msk.f32.gmra.mxu1 %vm437_vm1, %v3861_v30 }
 0x4fc   :  { %v3549_v33 = vpop.f32.mrf.mxu1 }
 0x4fd   :  { %v2483_v63 = vadd.f32 %v3549_v33, %v4721_v50 }
 0x4fe   :  { %v2477_v2 = vpop.f32.mrf.mxu1 }
 0x4ff   :  { %2637 = vst [vmem:[%s4853_s2 + $0x8] sm:$0xff] %v2483_v63  ;;  %v2478_v53 = vadd.f32 %v4721_v50, %v2477_v2 }
 0x500   :  { %v3552_v5 = vpop.f32.mrf.mxu1 }
 0x501   :  { %2636 = vst [vmem:[%s4853_s2] sm:$0xff] %v2478_v53  ;;  %v2493_v8 = vadd.f32 %v3552_v5, %v4721_v50 }
 0x502   :  { %v2487_v11 = vpop.f32.mrf.mxu1 }
 0x503   :  { %2639 = vst [vmem:[%s4853_s2 + $0x18] sm:$0xff] %v2493_v8  ;;  %v2488_v14 = vadd.f32 %v4721_v50, %v2487_v11 }
 0x504   :  { %v3555_v17 = vpop.f32.mrf.mxu1 }
 0x505   :  { %2638 = vst [vmem:[%s4853_s2 + $0x10] sm:$0xff] %v2488_v14  ;;  %v2503_v20 = vadd.f32 %v3555_v17, %v4721_v50 }
 0x506   :  { %v2497_v23 = vpop.f32.mrf.mxu1 }
 0x507   :  { %2641 = vst [vmem:[%s4853_s2 + $0x28] sm:$0xff] %v2503_v20  ;;  %v2498_v26 = vadd.f32 %v4721_v50, %v2497_v23 }
 0x508   :  { %v3558_v29 = vpop.f32.mrf.mxu1 }
 0x509   :  { %2640 = vst [vmem:[%s4853_s2 + $0x20] sm:$0xff] %v2498_v26  ;;  %v2513_v32 = vadd.f32 %v3558_v29, %v4721_v50 }
 0x50a   :  { %v2507_v35 = vpop.f32.mrf.mxu1 }
 0x50b   :  { %2643 = vst [vmem:[%s4853_s2 + $0x38] sm:$0xff] %v2513_v32  ;;  %v2508_v38 = vadd.f32 %v4721_v50, %v2507_v35 }
 0x50c   :  { %v3561_v41 = vpop.f32.mrf.mxu1 }
 0x50d   :  { %2642 = vst [vmem:[%s4853_s2 + $0x30] sm:$0xff] %v2508_v38  ;;  %v2523_v46 = vadd.f32 %v3561_v41, %v4721_v50 }
 0x50e   :  { %v2517_v51 = vpop.f32.mrf.mxu1 }
 0x50f   :  { %2645 = vst [vmem:[%s4853_s2 + $0x48] sm:$0xff] %v2523_v46  ;;  %v2518_v54 = vadd.f32 %v4721_v50, %v2517_v51 }
 0x510   :  { %v3564_v44 = vpop.f32.mrf.mxu1 }
 0x511   :  { %2644 = vst [vmem:[%s4853_s2 + $0x40] sm:$0xff] %v2518_v54  ;;  %v2533_v60 = vadd.f32 %v3564_v44, %v4721_v50 }
 0x512   :  { %v2527_v0 = vpop.f32.mrf.mxu1 }
 0x513   :  { %2647 = vst [vmem:[%s4853_s2 + $0x58] sm:$0xff] %v2533_v60  ;;  %v2528_v4 = vadd.f32 %v4721_v50, %v2527_v0 }
 0x514   :  { %v3567_v9 = vpop.f32.mrf.mxu1 }
 0x515   :  { %2646 = vst [vmem:[%s4853_s2 + $0x50] sm:$0xff] %v2528_v4  ;;  %v2543_v13 = vadd.f32 %v3567_v9, %v4721_v50 }
 0x516   :  { %v2537_v16 = vpop.f32.mrf.mxu1 }
 0x517   :  { %2649 = vst [vmem:[%s4853_s2 + $0x68] sm:$0xff] %v2543_v13  ;;  %v2538_v18 = vadd.f32 %v4721_v50, %v2537_v16 }
 0x518   :  { %v3570_v19 = vpop.f32.mrf.mxu1 }
 0x519   :  { %2648 = vst [vmem:[%s4853_s2 + $0x60] sm:$0xff] %v2538_v18  ;;  %v2553_v45 = vadd.f32 %v3570_v19, %v4721_v50 }
 0x51a   :  { %v2547_v21 = vpop.f32.mrf.mxu1 }
 0x51b   :  { %2651 = vst [vmem:[%s4853_s2 + $0x78] sm:$0xff] %v2553_v45  ;;  %v2548_v22 = vadd.f32 %v4721_v50, %v2547_v21 }
 0x51c   :  { %v3573_v24 = vpop.f32.mrf.mxu1 }
 0x51d   :  { %2650 = vst [vmem:[%s4853_s2 + $0x70] sm:$0xff] %v2548_v22  ;;  %v2563_v25 = vadd.f32 %v3573_v24, %v4721_v50 }
 0x51e   :  { %v2557_v61 = vpop.f32.mrf.mxu1 }
 0x51f   :  { %2653 = vst [vmem:[%s4853_s2 + $0x88] sm:$0xff] %v2563_v25  ;;  %v2558_v3 = vadd.f32 %v4721_v50, %v2557_v61 }
 0x520   :  { %v3576_v10 = vpop.f32.mrf.mxu1 }
 0x521   :  { %2652 = vst [vmem:[%s4853_s2 + $0x80] sm:$0xff] %v2558_v3  ;;  %v2573_v27 = vadd.f32 %v3576_v10, %v4721_v50 }
 0x522   :  { %v2567_v31 = vpop.f32.mrf.mxu1 }
 0x523   :  { %2655 = vst [vmem:[%s4853_s2 + $0x98] sm:$0xff] %v2573_v27  ;;  %v2568_v37 = vadd.f32 %v4721_v50, %v2567_v31 }
 0x524   :  { %v3579_v42 = vpop.f32.mrf.mxu1 }
 0x525   :  { %2654 = vst [vmem:[%s4853_s2 + $0x90] sm:$0xff] %v2568_v37  ;;  %v2583_v48 = vadd.f32 %v3579_v42, %v4721_v50 }
 0x526   :  { %v2577_v12 = vpop.f32.mrf.mxu1 }
 0x527   :  { %2657 = vst [vmem:[%s4853_s2 + $0xa8] sm:$0xff] %v2583_v48  ;;  %v2578_v28 = vadd.f32 %v4721_v50, %v2577_v12 }
 0x528   :  { %v3582_v52 = vpop.f32.mrf.mxu1 }
 0x529   :  { %2656 = vst [vmem:[%s4853_s2 + $0xa0] sm:$0xff] %v2578_v28  ;;  %v2593_v62 = vadd.f32 %v3582_v52, %v4721_v50 }
 0x52a   :  { %v2587_v43 = vpop.f32.mrf.mxu1 }
 0x52b   :  { %2659 = vst [vmem:[%s4853_s2 + $0xb8] sm:$0xff] %v2593_v62  ;;  %v2588_v36 = vadd.f32 %v4721_v50, %v2587_v43 }
 0x52c   :  { %v3585_v59 = vpop.f32.mrf.mxu1 }
 0x52d   :  { %2658 = vst [vmem:[%s4853_s2 + $0xb0] sm:$0xff] %v2588_v36  ;;  %v2603_v15 = vadd.f32 %v3585_v59, %v4721_v50 }
 0x52e   :  { %v2597_v55 = vpop.f32.mrf.mxu1 }
 0x52f   :  { %2661 = vst [vmem:[%s4853_s2 + $0xc8] sm:$0xff] %v2603_v15  ;;  %v2598_v7 = vadd.f32 %v4721_v50, %v2597_v55 }
 0x531   :  { %2660 = vst [vmem:[%s4853_s2 + $0xc0] sm:$0xff] %v2598_v7  ;;  %v3588_v39 = vpop.f32.mrf.mxu1 }
 0x532   :  { %v2613_v1 = vadd.f32 %v3588_v39, %v4721_v50 }
 0x533   :  { %v2607_v40 = vpop.f32.mrf.mxu1 }
 0x534   :  { %2663 = vst [vmem:[%s4853_s2 + $0xd8] sm:$0xff] %v2613_v1  ;;  %v2608_v58 = vadd.f32 %v4721_v50, %v2607_v40 }
 0x535   :  { %v3591_v56 = vpop.f32.mrf.mxu1 }
 0x536   :  { %2662 = vst [vmem:[%s4853_s2 + $0xd0] sm:$0xff] %v2608_v58  ;;  %v2623_v6 = vadd.f32 %v3591_v56, %v4721_v50 }
 0x537   :  { %v2617_v57 = vpop.f32.mrf.mxu1 }
 0x538   :  { %2665 = vst [vmem:[%s4853_s2 + $0xe8] sm:$0xff] %v2623_v6  ;;  %v2618_v49 = vadd.f32 %v4721_v50, %v2617_v57 }
 0x539   :  { %v3594_v34 = vpop.f32.mrf.mxu1 }
 0x53a   :  { %2664 = vst [vmem:[%s4853_s2 + $0xe0] sm:$0xff] %v2618_v49  ;;  %v2633_v47 = vadd.f32 %v3594_v34, %v4721_v50 }
 0x53b   :  { %v2627_v30 = vpop.f32.mrf.mxu1 }
 0x53c   :  { %2667 = vst [vmem:[%s4853_s2 + $0xf8] sm:$0xff] %v2633_v47  ;;  %v2628_v33 = vadd.f32 %v4721_v50, %v2627_v30 }
 0x53e   :  { %2666 = vst [vmem:[%s4853_s2 + $0xf0] sm:$0xff] %v2628_v33 }
 0x53f   :  { %2672 = vsyncpa [#allocation3], 1 }

</bundles_post_ra>
